<compile_context>
chip_gen: v7x
topology: tpu7x:2x2x1
jax: 0.10.0
libtpu: 0.0.40
codegen_flags: <defaults>
</compile_context>

<pallas_src>
import functools

import jax
import jax.numpy as jnp
from jax import lax
from jax.experimental import pallas as pl
from jax.experimental.pallas import tpu as pltpu

# Static module configuration (mirrors GNN(..., neighbor_aggr, readout, dropout))
NEIGHBOR_AGGR = "sum"   # 'sum' or 'mean'
READOUT = "sum"         # 'sum' or 'mean'
# TODO(synk): nn.Dropout is implemented as identity (inference/eval semantics);
# training-mode random dropout is not reproduced here.

LANE = 128
SUBLANE = 8


def _round_up(a, m):
    return ((a + m - 1) // m) * m


def _pad2(a, rows, cols):
    return jnp.pad(a, ((0, rows - a.shape[0]), (0, cols - a.shape[1])))


def _choose_tiles(n):
    """Pick (n_pad, row tile TM, contraction tile TK).

    N is padded to a 128/256/512 alignment (largest alignment whose padding
    overhead stays <=10%), then TM/TK are chosen as divisors of n_pad so no
    ragged tiles exist.  TM prefers a value that yields >=2 row tiles so the
    'parallel' grid axis can feed both TensorCores on v7x.
    """
    n = max(int(n), 1)
    n_pad = _round_up(max(n, LANE), LANE)
    for align in (512, 256):
        cand = _round_up(max(n, LANE), align)
        if (cand - n) * 10 <= n:
            n_pad = cand
            break
    tk = next(c for c in (512, 256, 128) if n_pad % c == 0)
    tm = next((c for c in (2048, 1024, 512, 256, 128)
               if n_pad % c == 0 and n_pad // c >= 2), None)
    if tm is None:
        tm = next(c for c in (2048, 1024, 512, 256, 128) if n_pad % c == 0)
    return n_pad, tm, tk


# ---------------------------------------------------------------------------
# Message-passing layer:
#   relu( h @ W_node + aggr(adj@h) @ W_msg + bias )     (output in bf16)
# ---------------------------------------------------------------------------
def _mp_kernel(neighbor_aggr,
               adj_ref, hk_ref, hi_ref, invdeg_ref,
               wn_ref, wm_ref, bn_ref, bm_ref,
               o_ref, acc_ref):
    k = pl.program_id(1)

    @pl.when(k == 0)
    def _():
        acc_ref[...] = jnp.zeros_like(acc_ref)

    # Dominant matmul: int8 tile from HBM -> bf16 on the VPU (two converts,
    # hidden under DMA) -> bf16 x bf16 MXU matmul with f32 accumulation.
    adj_bf16 = adj_ref[...].astype(jnp.float32).astype(jnp.bfloat16)
    acc_ref[...] += jnp.dot(adj_bf16, hk_ref[...],
                            preferred_element_type=jnp.float32)

    @pl.when(k == pl.num_programs(1) - 1)
    def _():
        h_node = hi_ref[...].astype(jnp.float32)        # (TM, D) once per row tile
        h_agg = acc_ref[...]                            # (TM, D) f32
        if neighbor_aggr == "mean":
            # fc1(adj@h)/deg == (adj@h * inv_deg) @ W_msg + b_msg * inv_deg,
            # with inv_deg precomputed exactly (f32) outside the kernel.
            inv_deg = invdeg_ref[...]                   # (TM, 1)
            h_agg = h_agg * inv_deg
            bias = bn_ref[...] + bm_ref[...] * inv_deg
        else:
            bias = bn_ref[...] + bm_ref[...]
        out = (jnp.dot(h_node, wn_ref[...], preferred_element_type=jnp.float32)
               + jnp.dot(h_agg, wm_ref[...], preferred_element_type=jnp.float32)
               + bias)
        o_ref[...] = jnp.maximum(out, 0.0).astype(o_ref.dtype)   # ReLU, bf16 out


def _mp_layer(h_bf16, adj_i8, inv_deg, w_node, w_msg, b_node, b_msg,
              neighbor_aggr, tm, tk):
    n_pad, d_in = h_bf16.shape
    d_out = w_node.shape[1]
    row_tiles = n_pad // tm
    grid = (row_tiles, n_pad // tk)

    flops = 2 * n_pad * n_pad * d_in + 2 * 2 * n_pad * d_in * d_out
    bytes_accessed = (n_pad * n_pad * 1                  # adj (int8), dominant
                      + row_tiles * n_pad * d_in * 2     # hk re-streamed per row tile
                      + n_pad * d_in * 2                 # hi (node rows, bf16)
                      + n_pad * 4                        # inverse degree
                      + n_pad * d_out * 2                # output (bf16)
                      + 2 * d_in * d_out * 4             # weights
                      + 2 * d_out * 4)                   # biases

    return pl.pallas_call(
        functools.partial(_mp_kernel, neighbor_aggr),
        out_shape=jax.ShapeDtypeStruct((n_pad, d_out), jnp.bfloat16),
        grid_spec=pltpu.PrefetchScalarGridSpec(
            num_scalar_prefetch=0,
            grid=grid,
            in_specs=[
                pl.BlockSpec((tm, tk), lambda i, k: (i, k)),       # adj tile (int8)
                pl.BlockSpec((tk, d_in), lambda i, k: (k, 0)),     # h, contraction rows
                pl.BlockSpec((tm, d_in), lambda i, k: (i, 0)),     # h, node rows
                pl.BlockSpec((tm, 1), lambda i, k: (i, 0)),        # inverse degree
                pl.BlockSpec((d_in, d_out), lambda i, k: (0, 0)),  # W_node (resident)
                pl.BlockSpec((d_in, d_out), lambda i, k: (0, 0)),  # W_msg (resident)
                pl.BlockSpec((1, d_out), lambda i, k: (0, 0)),     # b_node
                pl.BlockSpec((1, d_out), lambda i, k: (0, 0)),     # b_msg
            ],
            out_specs=pl.BlockSpec((tm, d_out), lambda i, k: (i, 0)),
            scratch_shapes=[
                pltpu.VMEM((tm, d_in), jnp.float32),   # adj@h accumulator
            ],
        ),
        compiler_params=pltpu.CompilerParams(
            dimension_semantics=("parallel", "arbitrary"),
            vmem_limit_bytes=48 * 1024 * 1024,   # safe on v5e/v6e/v7x; footprint ~6-20 MiB
        ),
        cost_estimate=pl.CostEstimate(flops=flops, transcendentals=0,
                                      bytes_accessed=bytes_accessed),
    )(adj_i8, h_bf16, h_bf16, inv_deg, w_node, w_msg, b_node, b_msg)


# ---------------------------------------------------------------------------
# Readout (scatter_add / mean over graph ids) + final Linear.  The one-hot
# pooling matrix is built in-kernel (iota vs. the graph-id row), so no [G, N]
# pool matrix ever touches HBM.
# ---------------------------------------------------------------------------
def _readout_kernel(readout,
                    idx_ref, h_ref, wfc_ref, bfc_ref,
                    o_ref, pooled_ref, cnt_ref):
    k = pl.program_id(0)

    @pl.when(k == 0)
    def _():
        pooled_ref[...] = jnp.zeros_like(pooled_ref)
        cnt_ref[...] = jnp.zeros_like(cnt_ref)

    g_pad = pooled_ref.shape[0]
    tk = idx_ref.shape[1]
    gids = lax.broadcasted_iota(jnp.int32, (g_pad, tk), 0)
    pool = (idx_ref[...] == gids).astype(jnp.bfloat16)          # one-hot [G, TK]
    pooled_ref[...] += jnp.dot(pool, h_ref[...],
                               preferred_element_type=jnp.float32)
    if readout == "mean":
        cnt_ref[...] += jnp.sum(pool.astype(jnp.float32), axis=1, keepdims=True)

    @pl.when(k == pl.num_programs(0) - 1)
    def _():
        pooled = pooled_ref[...]
        if readout == "mean":
            # TODO(synk): empty graphs would be 0/0 (nan) in the reference;
            # guard keeps padded graph slots finite.
            pooled = pooled / jnp.maximum(cnt_ref[...], 1.0)
        o_ref[...] = (jnp.dot(pooled, wfc_ref[...],
                              preferred_element_type=jnp.float32)
                      + bfc_ref[...])


def _readout_fc(h_bf16, idx_row, wfc, bfc, g_pad, readout, tile):
    n_pad, d_h = h_bf16.shape
    d_out = wfc.shape[1]
    return pl.pallas_call(
        functools.partial(_readout_kernel, readout),
        out_shape=jax.ShapeDtypeStruct((g_pad, d_out), jnp.float32),
        grid_spec=pltpu.PrefetchScalarGridSpec(
            num_scalar_prefetch=0,
            grid=(n_pad // tile,),
            in_specs=[
                pl.BlockSpec((1, tile), lambda k: (0, k)),      # graph ids
                pl.BlockSpec((tile, d_h), lambda k: (k, 0)),    # node features (bf16)
                pl.BlockSpec((d_h, d_out), lambda k: (0, 0)),   # fc weight (resident)
                pl.BlockSpec((1, d_out), lambda k: (0, 0)),     # fc bias
            ],
            out_specs=pl.BlockSpec((g_pad, d_out), lambda k: (0, 0)),
            scratch_shapes=[
                pltpu.VMEM((g_pad, d_h), jnp.float32),          # pooled accumulator
                pltpu.VMEM((g_pad, 1), jnp.float32),            # node counts (mean)
            ],
        ),
        compiler_params=pltpu.CompilerParams(
            dimension_semantics=("arbitrary",),
            vmem_limit_bytes=48 * 1024 * 1024,
        ),
    )(idx_row, h_bf16, wfc, bfc)


# ---------------------------------------------------------------------------
# One-time prep (cache this per graph batch) + jitted forward
# ---------------------------------------------------------------------------
def prepare_gnn_inputs(x, adj, idx, params, num_graphs,
                       neighbor_aggr=NEIGHBOR_AGGR):
    """Pad / down-cast everything once.  Returns (prep_arrays, static_cfg)."""
    n, d_in = x.shape
    n_pad, tm, tk = _choose_tiles(n)
    (w1a, b1a, w1b, b1b, w2a, b2a, w2b, b2b, wfc, bfc) = params
    d_hid = w1a.shape[1]
    d_out = wfc.shape[1]
    dp_in = _round_up(d_in, LANE)
    dp_hid = _round_up(d_hid, LANE)
    dp_out = _round_up(d_out, LANE)
    g_pad = _round_up(max(num_graphs, SUBLANE), SUBLANE)

    adj_f = adj.astype(jnp.float32)
    # int8 adjacency: exact for a 0/1 adjacency, 1 B/elem in HBM.
    # TODO(synk): a weighted (non-binary) adjacency would be silently lossy here.
    adj_i8 = _pad2(adj_f, n_pad, n_pad).astype(jnp.int8)

    # Exact inverse degree, computed once (only used for 'mean' aggregation).
    # TODO(synk): reference divides by deg exactly (inf/nan for isolated nodes);
    # we clamp deg>=1 to keep padded / isolated rows finite.
    deg = jnp.sum(adj_f, axis=1, keepdims=True)
    inv_deg = _pad2(1.0 / jnp.maximum(deg, 1.0), n_pad, 1)

    x_p = _pad2(x.astype(jnp.float32), n_pad, dp_in).astype(jnp.bfloat16)
    # padded node slots get graph id -1 -> never pooled by the readout.
    idx_row = jnp.full((1, n_pad), -1, jnp.int32).at[0, :n].set(idx.astype(jnp.int32))

    pp = dict(
        w1n=_pad2(w1b, dp_in, dp_hid), w1m=_pad2(w1a, dp_in, dp_hid),
        b1n=_pad2(b1b, 1, dp_hid), b1m=_pad2(b1a, 1, dp_hid),
        w2n=_pad2(w2b, dp_hid, dp_hid), w2m=_pad2(w2a, dp_hid, dp_hid),
        b2n=_pad2(b2b, 1, dp_hid), b2m=_pad2(b2a, 1, dp_hid),
        wfc=_pad2(wfc, dp_hid, dp_out), bfc=_pad2(bfc, 1, dp_out),
    )
    prep = (x_p, adj_i8, inv_deg, idx_row, pp)
    static = dict(num_graphs=int(num_graphs), d_out=int(d_out), g_pad=int(g_pad),
                  tm=int(tm), tk=int(tk), neighbor_aggr=neighbor_aggr)
    return prep, static


@functools.partial(jax.jit,
                   static_argnames=("num_graphs", "d_out", "g_pad", "tm", "tk",
                                    "neighbor_aggr", "readout"))
def gnn_forward_prepared(x_p, adj_i8, inv_deg, idx_row, pp,
                         num_graphs, d_out, g_pad, tm, tk,
                         neighbor_aggr=NEIGHBOR_AGGR, readout=READOUT):
    h1 = _mp_layer(x_p, adj_i8, inv_deg, pp["w1n"], pp["w1m"], pp["b1n"], pp["b1m"],
                   neighbor_aggr, tm, tk)
    h2 = _mp_layer(h1, adj_i8, inv_deg, pp["w2n"], pp["w2m"], pp["b2n"], pp["b2m"],
                   neighbor_aggr, tm, tk)
    out = _readout_fc(h2, idx_row, pp["wfc"], pp["bfc"], g_pad, readout, tk)
    return out[:num_graphs, :d_out]


def gnn_forward(x, adj, idx, params, num_graphs,
                neighbor_aggr=NEIGHBOR_AGGR, readout=READOUT):
    """Convenience one-shot wrapper (prep + forward).  For repeated calls on the
    same graph batch, call prepare_gnn_inputs once and reuse its result."""
    prep, st = prepare_gnn_inputs(x, adj, idx, params, num_graphs, neighbor_aggr)
    return gnn_forward_prepared(*prep, readout=readout, **st)


# ---------------------------------------------------------------------------
# Params + pure-JAX reference
# ---------------------------------------------------------------------------
def init_params(key, input_dim, hidden_dim, output_dim):
    """Deterministic init. Linear weights stored as [in, out]; biases as [1, out]."""
    ks = jax.random.split(key, 10)

    def lin(kw, kb, din, dout):
        w = jax.random.normal(kw, (din, dout), jnp.float32) * (1.0 / jnp.sqrt(din))
        b = jax.random.normal(kb, (1, dout), jnp.float32) * 0.01
        return w, b

    w1a, b1a = lin(ks[0], ks[1], input_dim, hidden_dim)   # mp1.fc1
    w1b, b1b = lin(ks[2], ks[3], input_dim, hidden_dim)   # mp1.fc2
    w2a, b2a = lin(ks[4], ks[5], hidden_dim, hidden_dim)  # mp2.fc1
    w2b, b2b = lin(ks[6], ks[7], hidden_dim, hidden_dim)  # mp2.fc2
    wfc, bfc = lin(ks[8], ks[9], hidden_dim, output_dim)  # fc
    return (w1a, b1a, w1b, b1b, w2a, b2a, w2b, b2b, wfc, bfc)


def gnn_reference(x, adj, idx, params, num_graphs, neighbor_aggr, readout):
    """Pure-JAX f32 reference mirroring the PyTorch forward (eval mode)."""
    (w1a, b1a, w1b, b1b, w2a, b2a, w2b, b2b, wfc, bfc) = params

    def mp(h, wm, bm, wn, bn):
        m = (adj @ h) @ wm + bm
        hn = h @ wn + bn
        if neighbor_aggr == "sum":
            return hn + m
        deg = adj @ jnp.ones((h.shape[0], 1), jnp.float32)
        return hn + m / deg

    h = jax.nn.relu(mp(x, w1a, b1a, w1b, b1b))
    h = jax.nn.relu(mp(h, w2a, b2a, w2b, b2b))
    out = jax.ops.segment_sum(h, idx, num_segments=num_graphs)
    if readout == "mean":
        cnt = jax.ops.segment_sum(jnp.ones_like(h), idx, num_segments=num_graphs)
        out = out / cnt
    return out @ wfc + bfc


if __name__ == "__main__":
    key = jax.random.PRNGKey(0)
    k_x, k_adj, k_p = jax.random.split(key, 3)

    # small graph batch: N=16 nodes, 2 graphs (8 nodes each)
    N, input_dim, hidden_dim, output_dim = 16, 32, 32, 8
    num_graphs = 2
    x = jax.random.normal(k_x, (N, input_dim), jnp.float32)
    # symmetric binary adjacency with self-loops
    a = (jax.random.uniform(k_adj, (N, N)) < 0.3).astype(jnp.float32)
    adj = jnp.clip(a + a.T + jnp.eye(N, dtype=jnp.float32), 0.0, 1.0)
    idx = jnp.concatenate([jnp.zeros(8, jnp.int32), jnp.ones(8, jnp.int32)])

    params = init_params(k_p, input_dim, hidden_dim, output_dim)

    # Prep once (cached per graph batch), forward via Pallas kernels.
    prep, static_cfg = prepare_gnn_inputs(x, adj, idx, params, num_graphs,
                                          neighbor_aggr=NEIGHBOR_AGGR)
    out = gnn_forward_prepared(*prep, readout=READOUT, **static_cfg)
    out = jax.block_until_ready(out)

    ref = gnn_reference(x, adj, idx, params, num_graphs, NEIGHBOR_AGGR, READOUT)
    assert out.shape == (num_graphs, output_dim)
    # adj@h runs in bf16 and activations are carried in bf16 between layers
    # (f32 accumulation everywhere): allow ~2% relative error vs f32 reference.
    rel_err = float(jnp.linalg.norm(out - ref) / (jnp.linalg.norm(ref) + 1e-12))
    assert rel_err < 2e-2, f"mismatch vs reference: rel_err={rel_err}"

    print("KERNEL_OK")
</pallas_src>

<mosaic_0001>
module attributes {stable_mosaic.version = 11 : i64} {
  func.func @_mp_kernel(%arg0: i32, %arg1: i32, %arg2: memref<128x128xi8, #tpu.memory_space<vmem>>, %arg3: memref<128x128xbf16, #tpu.memory_space<vmem>>, %arg4: memref<128x128xbf16, #tpu.memory_space<vmem>>, %arg5: memref<128x1xf32, #tpu.memory_space<vmem>>, %arg6: memref<128x128xf32, #tpu.memory_space<vmem>>, %arg7: memref<128x128xf32, #tpu.memory_space<vmem>>, %arg8: memref<1x128xf32, #tpu.memory_space<vmem>>, %arg9: memref<1x128xf32, #tpu.memory_space<vmem>>, %arg10: memref<128x128xbf16, #tpu.memory_space<vmem>>, %arg11: memref<128x128xf32, #tpu.memory_space<vmem>>) attributes {dimension_semantics = [#tpu.dimension_semantics<parallel>, #tpu.dimension_semantics<arbitrary>], iteration_bounds = array<i64: 1, 1>, scalar_prefetch = 0 : i64, scratch_operands = 1 : i64, tpu.core_type = #tpu.core_type<tc>, window_params = [{transform_indices = @transform_0, window_bounds = array<i64: 128, 128>}, {transform_indices = @transform_1, window_bounds = array<i64: 128, 128>}, {transform_indices = @transform_2, window_bounds = array<i64: 128, 128>}, {transform_indices = @transform_3, window_bounds = array<i64: 128, 1>}, {pipeline_mode = #tpu.pipeline_mode<synchronous>, transform_indices = @transform_4, window_bounds = array<i64: 128, 128>}, {pipeline_mode = #tpu.pipeline_mode<synchronous>, transform_indices = @transform_5, window_bounds = array<i64: 128, 128>}, {pipeline_mode = #tpu.pipeline_mode<synchronous>, transform_indices = @transform_6, window_bounds = array<i64: 1, 128>}, {pipeline_mode = #tpu.pipeline_mode<synchronous>, transform_indices = @transform_7, window_bounds = array<i64: 1, 128>}, {transform_indices = @transform_8, window_bounds = array<i64: 128, 128>}]} {
    %c0_i32 = arith.constant 0 : i32
    %0 = arith.cmpi eq, %arg1, %c0_i32 : i32
    %1 = arith.extui %0 : i1 to i32
    %c0_i32_0 = arith.constant 0 : i32
    %2 = arith.cmpi ne, %1, %c0_i32_0 : i32
    scf.if %2 {
      %cst_10 = arith.constant 0.000000e+00 : f32
      %14 = vector.broadcast %cst_10 : f32 to vector<128x128xf32>
      %c0_11 = arith.constant 0 : index
      %c0_12 = arith.constant 0 : index
      %15 = vector.load %arg11[%c0_11, %c0_12] : memref<128x128xf32, #tpu.memory_space<vmem>>, vector<128x128xf32>
      tpu.vector_store %arg11[%c0_11, %c0_12], %14 {strides = array<i32>} : memref<128x128xf32, #tpu.memory_space<vmem>>, vector<128x128xf32>,
    } else {
    }
    %c0 = arith.constant 0 : index
    %c0_1 = arith.constant 0 : index
    %3 = vector.load %arg2[%c0, %c0_1] : memref<128x128xi8, #tpu.memory_space<vmem>>, vector<128x128xi8>
    %4 = arith.sitofp %3 : vector<128x128xi8> to vector<128x128xf32>
    %5 = arith.truncf %4 : vector<128x128xf32> to vector<128x128xbf16>
    %c0_2 = arith.constant 0 : index
    %c0_3 = arith.constant 0 : index
    %6 = vector.load %arg11[%c0_2, %c0_3] : memref<128x128xf32, #tpu.memory_space<vmem>>, vector<128x128xf32>
    %c0_4 = arith.constant 0 : index
    %c0_5 = arith.constant 0 : index
    %7 = vector.load %arg3[%c0_4, %c0_5] : memref<128x128xbf16, #tpu.memory_space<vmem>>, vector<128x128xbf16>
    %cst = arith.constant dense<0.000000e+00> : vector<128x128xf32>
    %8 = tpu.matmul %5, %7, %cst {dimension_numbers = #tpu.dot_dimension_numbers<[1], [0], [0], [1], [0, 0, 1, 1], [], []>} : vector<128x128xbf16>, vector<128x128xbf16>, vector<128x128xf32> -> vector<128x128xf32>
    %9 = arith.addf %6, %8 : vector<128x128xf32>
    %c0_6 = arith.constant 0 : index
    %c0_7 = arith.constant 0 : index
    %10 = vector.load %arg11[%c0_6, %c0_7] : memref<128x128xf32, #tpu.memory_space<vmem>>, vector<128x128xf32>
    tpu.vector_store %arg11[%c0_6, %c0_7], %9 {strides = array<i32>} : memref<128x128xf32, #tpu.memory_space<vmem>>, vector<128x128xf32>,
    %c0_i32_8 = arith.constant 0 : i32
    %11 = arith.cmpi eq, %arg1, %c0_i32_8 : i32
    %12 = arith.extui %11 : i1 to i32
    %c0_i32_9 = arith.constant 0 : i32
    %13 = arith.cmpi ne, %12, %c0_i32_9 : i32
    scf.if %13 {
      %c0_10 = arith.constant 0 : index
      %c0_11 = arith.constant 0 : index
      %14 = vector.load %arg4[%c0_10, %c0_11] : memref<128x128xbf16, #tpu.memory_space<vmem>>, vector<128x128xbf16>
      %15 = arith.extf %14 : vector<128x128xbf16> to vector<128x128xf32>
      %c0_12 = arith.constant 0 : index
      %c0_13 = arith.constant 0 : index
      %16 = vector.load %arg11[%c0_12, %c0_13] : memref<128x128xf32, #tpu.memory_space<vmem>>, vector<128x128xf32>
      %c0_14 = arith.constant 0 : index
      %c0_15 = arith.constant 0 : index
      %17 = vector.load %arg8[%c0_14, %c0_15] : memref<1x128xf32, #tpu.memory_space<vmem>>, vector<1x128xf32>
      %c0_16 = arith.constant 0 : index
      %c0_17 = arith.constant 0 : index
      %18 = vector.load %arg9[%c0_16, %c0_17] : memref<1x128xf32, #tpu.memory_space<vmem>>, vector<1x128xf32>
      %19 = arith.addf %17, %18 : vector<1x128xf32>
      %c0_18 = arith.constant 0 : index
      %c0_19 = arith.constant 0 : index
      %20 = vector.load %arg6[%c0_18, %c0_19] : memref<128x128xf32, #tpu.memory_space<vmem>>, vector<128x128xf32>
      %cst_20 = arith.constant dense<0.000000e+00> : vector<128x128xf32>
      %21 = tpu.matmul %15, %20, %cst_20 {dimension_numbers = #tpu.dot_dimension_numbers<[1], [0], [0], [1], [0, 0, 1, 1], [], []>} : vector<128x128xf32>, vector<128x128xf32>, vector<128x128xf32> -> vector<128x128xf32>
      %c0_21 = arith.constant 0 : index
      %c0_22 = arith.constant 0 : index
      %22 = vector.load %arg7[%c0_21, %c0_22] : memref<128x128xf32, #tpu.memory_space<vmem>>, vector<128x128xf32>
      %cst_23 = arith.constant dense<0.000000e+00> : vector<128x128xf32>
      %23 = tpu.matmul %16, %22, %cst_23 {dimension_numbers = #tpu.dot_dimension_numbers<[1], [0], [0], [1], [0, 0, 1, 1], [], []>} : vector<128x128xf32>, vector<128x128xf32>, vector<128x128xf32> -> vector<128x128xf32>
      %24 = arith.addf %21, %23 : vector<128x128xf32>
      %25 = vector.broadcast %19 : vector<1x128xf32> to vector<128x128xf32>
      %26 = arith.addf %24, %25 : vector<128x128xf32>
      %cst_24 = arith.constant 0.000000e+00 : f32
      %27 = vector.broadcast %cst_24 : f32 to vector<128x128xf32>
      %28 = arith.maximumf %26, %27 : vector<128x128xf32>
      %29 = arith.truncf %28 : vector<128x128xf32> to vector<128x128xbf16>
      %c0_25 = arith.constant 0 : index
      %c0_26 = arith.constant 0 : index
      %30 = vector.load %arg10[%c0_25, %c0_26] : memref<128x128xbf16, #tpu.memory_space<vmem>>, vector<128x128xbf16>
      tpu.vector_store %arg10[%c0_25, %c0_26], %29 {strides = array<i32>} : memref<128x128xbf16, #tpu.memory_space<vmem>>, vector<128x128xbf16>,
    } else {
    }
    return
  }
  func.func @transform_0(%arg0: i32, %arg1: i32) -> (i32, i32) {
    %c0_i32 = arith.constant 0 : i32
    return %arg0, %arg1 : i32, i32
  }
  func.func @transform_1(%arg0: i32, %arg1: i32) -> (i32, i32) {
    %c0_i32 = arith.constant 0 : i32
    %c0_i32_0 = arith.constant 0 : i32
    return %arg1, %c0_i32 : i32, i32
  }
  func.func @transform_2(%arg0: i32, %arg1: i32) -> (i32, i32) {
    %c0_i32 = arith.constant 0 : i32
    %c0_i32_0 = arith.constant 0 : i32
    return %arg0, %c0_i32 : i32, i32
  }
  func.func @transform_3(%arg0: i32, %arg1: i32) -> (i32, i32) {
    %c0_i32 = arith.constant 0 : i32
    %c0_i32_0 = arith.constant 0 : i32
    return %arg0, %c0_i32 : i32, i32
  }
  func.func @transform_4(%arg0: i32, %arg1: i32) -> (i32, i32) {
    %c0_i32 = arith.constant 0 : i32
    %c0_i32_0 = arith.constant 0 : i32
    %c0_i32_1 = arith.constant 0 : i32
    return %c0_i32, %c0_i32_0 : i32, i32
  }
  func.func @transform_5(%arg0: i32, %arg1: i32) -> (i32, i32) {
    %c0_i32 = arith.constant 0 : i32
    %c0_i32_0 = arith.constant 0 : i32
    %c0_i32_1 = arith.constant 0 : i32
    return %c0_i32, %c0_i32_0 : i32, i32
  }
  func.func @transform_6(%arg0: i32, %arg1: i32) -> (i32, i32) {
    %c0_i32 = arith.constant 0 : i32
    %c0_i32_0 = arith.constant 0 : i32
    %c0_i32_1 = arith.constant 0 : i32
    return %c0_i32, %c0_i32_0 : i32, i32
  }
  func.func @transform_7(%arg0: i32, %arg1: i32) -> (i32, i32) {
    %c0_i32 = arith.constant 0 : i32
    %c0_i32_0 = arith.constant 0 : i32
    %c0_i32_1 = arith.constant 0 : i32
    return %c0_i32, %c0_i32_0 : i32, i32
  }
  func.func @transform_8(%arg0: i32, %arg1: i32) -> (i32, i32) {
    %c0_i32 = arith.constant 0 : i32
    %c0_i32_0 = arith.constant 0 : i32
    return %arg0, %c0_i32 : i32, i32
  }
}

module attributes {stable_mosaic.version = 11 : i64} {
  func.func @_mp_kernel(%arg0: i32, %arg1: i32, %arg2: memref<128x128xi8, #tpu.memory_space<vmem>>, %arg3: memref<128x128xbf16, #tpu.memory_space<vmem>>, %arg4: memref<128x128xbf16, #tpu.memory_space<vmem>>, %arg5: memref<128x1xf32, #tpu.memory_space<vmem>>, %arg6: memref<128x128xf32, #tpu.memory_space<vmem>>, %arg7: memref<128x128xf32, #tpu.memory_space<vmem>>, %arg8: memref<1x128xf32, #tpu.memory_space<vmem>>, %arg9: memref<1x128xf32, #tpu.memory_space<vmem>>, %arg10: memref<128x128xbf16, #tpu.memory_space<vmem>>, %arg11: memref<128x128xf32, #tpu.memory_space<vmem>>) attributes {dimension_semantics = [#tpu.dimension_semantics<parallel>, #tpu.dimension_semantics<arbitrary>], iteration_bounds = array<i64: 1, 1>, scalar_prefetch = 0 : i64, scratch_operands = 1 : i64, tpu.core_type = #tpu.core_type<tc>, window_params = [{transform_indices = @transform_0, window_bounds = array<i64: 128, 128>}, {transform_indices = @transform_1, window_bounds = array<i64: 128, 128>}, {transform_indices = @transform_2, window_bounds = array<i64: 128, 128>}, {transform_indices = @transform_3, window_bounds = array<i64: 128, 1>}, {pipeline_mode = #tpu.pipeline_mode<synchronous>, transform_indices = @transform_4, window_bounds = array<i64: 128, 128>}, {pipeline_mode = #tpu.pipeline_mode<synchronous>, transform_indices = @transform_5, window_bounds = array<i64: 128, 128>}, {pipeline_mode = #tpu.pipeline_mode<synchronous>, transform_indices = @transform_6, window_bounds = array<i64: 1, 128>}, {pipeline_mode = #tpu.pipeline_mode<synchronous>, transform_indices = @transform_7, window_bounds = array<i64: 1, 128>}, {transform_indices = @transform_8, window_bounds = array<i64: 128, 128>}]} {
    %c0_i32 = arith.constant 0 : i32
    %0 = arith.cmpi eq, %arg1, %c0_i32 : i32
    %1 = arith.extui %0 : i1 to i32
    %c0_i32_0 = arith.constant 0 : i32
    %2 = arith.cmpi ne, %1, %c0_i32_0 : i32
    scf.if %2 {
      %cst_10 = arith.constant 0.000000e+00 : f32
      %14 = vector.broadcast %cst_10 : f32 to vector<128x128xf32>
      %c0_11 = arith.constant 0 : index
      %c0_12 = arith.constant 0 : index
      %15 = vector.load %arg11[%c0_11, %c0_12] : memref<128x128xf32, #tpu.memory_space<vmem>>, vector<128x128xf32>
      tpu.vector_store %arg11[%c0_11, %c0_12], %14 {strides = array<i32>} : memref<128x128xf32, #tpu.memory_space<vmem>>, vector<128x128xf32>,
    } else {
    }
    %c0 = arith.constant 0 : index
    %c0_1 = arith.constant 0 : index
    %3 = vector.load %arg2[%c0, %c0_1] : memref<128x128xi8, #tpu.memory_space<vmem>>, vector<128x128xi8>
    %4 = arith.sitofp %3 : vector<128x128xi8> to vector<128x128xf32>
    %5 = arith.truncf %4 : vector<128x128xf32> to vector<128x128xbf16>
    %c0_2 = arith.constant 0 : index
    %c0_3 = arith.constant 0 : index
    %6 = vector.load %arg11[%c0_2, %c0_3] : memref<128x128xf32, #tpu.memory_space<vmem>>, vector<128x128xf32>
    %c0_4 = arith.constant 0 : index
    %c0_5 = arith.constant 0 : index
    %7 = vector.load %arg3[%c0_4, %c0_5] : memref<128x128xbf16, #tpu.memory_space<vmem>>, vector<128x128xbf16>
    %cst = arith.constant dense<0.000000e+00> : vector<128x128xf32>
    %8 = tpu.matmul %5, %7, %cst {dimension_numbers = #tpu.dot_dimension_numbers<[1], [0], [0], [1], [0, 0, 1, 1], [], []>} : vector<128x128xbf16>, vector<128x128xbf16>, vector<128x128xf32> -> vector<128x128xf32>
    %9 = arith.addf %6, %8 : vector<128x128xf32>
    %c0_6 = arith.constant 0 : index
    %c0_7 = arith.constant 0 : index
    %10 = vector.load %arg11[%c0_6, %c0_7] : memref<128x128xf32, #tpu.memory_space<vmem>>, vector<128x128xf32>
    tpu.vector_store %arg11[%c0_6, %c0_7], %9 {strides = array<i32>} : memref<128x128xf32, #tpu.memory_space<vmem>>, vector<128x128xf32>,
    %c0_i32_8 = arith.constant 0 : i32
    %11 = arith.cmpi eq, %arg1, %c0_i32_8 : i32
    %12 = arith.extui %11 : i1 to i32
    %c0_i32_9 = arith.constant 0 : i32
    %13 = arith.cmpi ne, %12, %c0_i32_9 : i32
    scf.if %13 {
      %c0_10 = arith.constant 0 : index
      %c0_11 = arith.constant 0 : index
      %14 = vector.load %arg4[%c0_10, %c0_11] : memref<128x128xbf16, #tpu.memory_space<vmem>>, vector<128x128xbf16>
      %15 = arith.extf %14 : vector<128x128xbf16> to vector<128x128xf32>
      %c0_12 = arith.constant 0 : index
      %c0_13 = arith.constant 0 : index
      %16 = vector.load %arg11[%c0_12, %c0_13] : memref<128x128xf32, #tpu.memory_space<vmem>>, vector<128x128xf32>
      %c0_14 = arith.constant 0 : index
      %c0_15 = arith.constant 0 : index
      %17 = vector.load %arg8[%c0_14, %c0_15] : memref<1x128xf32, #tpu.memory_space<vmem>>, vector<1x128xf32>
      %c0_16 = arith.constant 0 : index
      %c0_17 = arith.constant 0 : index
      %18 = vector.load %arg9[%c0_16, %c0_17] : memref<1x128xf32, #tpu.memory_space<vmem>>, vector<1x128xf32>
      %19 = arith.addf %17, %18 : vector<1x128xf32>
      %c0_18 = arith.constant 0 : index
      %c0_19 = arith.constant 0 : index
      %20 = vector.load %arg6[%c0_18, %c0_19] : memref<128x128xf32, #tpu.memory_space<vmem>>, vector<128x128xf32>
      %cst_20 = arith.constant dense<0.000000e+00> : vector<128x128xf32>
      %21 = tpu.matmul %15, %20, %cst_20 {dimension_numbers = #tpu.dot_dimension_numbers<[1], [0], [0], [1], [0, 0, 1, 1], [], []>} : vector<128x128xf32>, vector<128x128xf32>, vector<128x128xf32> -> vector<128x128xf32>
      %c0_21 = arith.constant 0 : index
      %c0_22 = arith.constant 0 : index
      %22 = vector.load %arg7[%c0_21, %c0_22] : memref<128x128xf32, #tpu.memory_space<vmem>>, vector<128x128xf32>
      %cst_23 = arith.constant dense<0.000000e+00> : vector<128x128xf32>
      %23 = tpu.matmul %16, %22, %cst_23 {dimension_numbers = #tpu.dot_dimension_numbers<[1], [0], [0], [1], [0, 0, 1, 1], [], []>} : vector<128x128xf32>, vector<128x128xf32>, vector<128x128xf32> -> vector<128x128xf32>
      %24 = arith.addf %21, %23 : vector<128x128xf32>
      %25 = vector.broadcast %19 : vector<1x128xf32> to vector<128x128xf32>
      %26 = arith.addf %24, %25 : vector<128x128xf32>
      %cst_24 = arith.constant 0.000000e+00 : f32
      %27 = vector.broadcast %cst_24 : f32 to vector<128x128xf32>
      %28 = arith.maximumf %26, %27 : vector<128x128xf32>
      %29 = arith.truncf %28 : vector<128x128xf32> to vector<128x128xbf16>
      %c0_25 = arith.constant 0 : index
      %c0_26 = arith.constant 0 : index
      %30 = vector.load %arg10[%c0_25, %c0_26] : memref<128x128xbf16, #tpu.memory_space<vmem>>, vector<128x128xbf16>
      tpu.vector_store %arg10[%c0_25, %c0_26], %29 {strides = array<i32>} : memref<128x128xbf16, #tpu.memory_space<vmem>>, vector<128x128xbf16>,
    } else {
    }
    return
  }
  func.func @transform_0(%arg0: i32, %arg1: i32) -> (i32, i32) {
    %c0_i32 = arith.constant 0 : i32
    return %arg0, %arg1 : i32, i32
  }
  func.func @transform_1(%arg0: i32, %arg1: i32) -> (i32, i32) {
    %c0_i32 = arith.constant 0 : i32
    %c0_i32_0 = arith.constant 0 : i32
    return %arg1, %c0_i32 : i32, i32
  }
  func.func @transform_2(%arg0: i32, %arg1: i32) -> (i32, i32) {
    %c0_i32 = arith.constant 0 : i32
    %c0_i32_0 = arith.constant 0 : i32
    return %arg0, %c0_i32 : i32, i32
  }
  func.func @transform_3(%arg0: i32, %arg1: i32) -> (i32, i32) {
    %c0_i32 = arith.constant 0 : i32
    %c0_i32_0 = arith.constant 0 : i32
    return %arg0, %c0_i32 : i32, i32
  }
  func.func @transform_4(%arg0: i32, %arg1: i32) -> (i32, i32) {
    %c0_i32 = arith.constant 0 : i32
    %c0_i32_0 = arith.constant 0 : i32
    %c0_i32_1 = arith.constant 0 : i32
    return %c0_i32, %c0_i32_0 : i32, i32
  }
  func.func @transform_5(%arg0: i32, %arg1: i32) -> (i32, i32) {
    %c0_i32 = arith.constant 0 : i32
    %c0_i32_0 = arith.constant 0 : i32
    %c0_i32_1 = arith.constant 0 : i32
    return %c0_i32, %c0_i32_0 : i32, i32
  }
  func.func @transform_6(%arg0: i32, %arg1: i32) -> (i32, i32) {
    %c0_i32 = arith.constant 0 : i32
    %c0_i32_0 = arith.constant 0 : i32
    %c0_i32_1 = arith.constant 0 : i32
    return %c0_i32, %c0_i32_0 : i32, i32
  }
  func.func @transform_7(%arg0: i32, %arg1: i32) -> (i32, i32) {
    %c0_i32 = arith.constant 0 : i32
    %c0_i32_0 = arith.constant 0 : i32
    %c0_i32_1 = arith.constant 0 : i32
    return %c0_i32, %c0_i32_0 : i32, i32
  }
  func.func @transform_8(%arg0: i32, %arg1: i32) -> (i32, i32) {
    %c0_i32 = arith.constant 0 : i32
    %c0_i32_0 = arith.constant 0 : i32
    return %arg0, %c0_i32 : i32, i32
  }
}

module attributes {stable_mosaic.version = 11 : i64} {
  func.func @_readout_kernel(%arg0: i32, %arg1: memref<1x128xi32, #tpu.memory_space<vmem>>, %arg2: memref<128x128xbf16, #tpu.memory_space<vmem>>, %arg3: memref<128x128xf32, #tpu.memory_space<vmem>>, %arg4: memref<1x128xf32, #tpu.memory_space<vmem>>, %arg5: memref<8x128xf32, #tpu.memory_space<vmem>>, %arg6: memref<8x128xf32, #tpu.memory_space<vmem>>, %arg7: memref<8x1xf32, #tpu.memory_space<vmem>>) attributes {dimension_semantics = [#tpu.dimension_semantics<arbitrary>], iteration_bounds = array<i64: 1>, scalar_prefetch = 0 : i64, scratch_operands = 2 : i64, tpu.core_type = #tpu.core_type<tc>, window_params = [{transform_indices = @transform_0, window_bounds = array<i64: 1, 128>}, {transform_indices = @transform_1, window_bounds = array<i64: 128, 128>}, {pipeline_mode = #tpu.pipeline_mode<synchronous>, transform_indices = @transform_2, window_bounds = array<i64: 128, 128>}, {pipeline_mode = #tpu.pipeline_mode<synchronous>, transform_indices = @transform_3, window_bounds = array<i64: 1, 128>}, {pipeline_mode = #tpu.pipeline_mode<synchronous>, transform_indices = @transform_4, window_bounds = array<i64: 8, 128>}]} {
    %c0_i32 = arith.constant 0 : i32
    %0 = arith.cmpi eq, %arg0, %c0_i32 : i32
    %1 = arith.extui %0 : i1 to i32
    %c0_i32_0 = arith.constant 0 : i32
    %2 = arith.cmpi ne, %1, %c0_i32_0 : i32
    scf.if %2 {
      %cst_10 = arith.constant 0.000000e+00 : f32
      %18 = vector.broadcast %cst_10 : f32 to vector<8x128xf32>
      %c0_11 = arith.constant 0 : index
      %c0_12 = arith.constant 0 : index
      %19 = vector.load %arg6[%c0_11, %c0_12] : memref<8x128xf32, #tpu.memory_space<vmem>>, vector<8x128xf32>
      tpu.vector_store %arg6[%c0_11, %c0_12], %18 {strides = array<i32>} : memref<8x128xf32, #tpu.memory_space<vmem>>, vector<8x128xf32>,
      %cst_13 = arith.constant 0.000000e+00 : f32
      %20 = vector.broadcast %cst_13 : f32 to vector<8x1xf32>
      %c0_14 = arith.constant 0 : index
      %c0_15 = arith.constant 0 : index
      %21 = vector.load %arg7[%c0_14, %c0_15] : memref<8x1xf32, #tpu.memory_space<vmem>>, vector<8x1xf32>
      tpu.vector_store %arg7[%c0_14, %c0_15], %20 {strides = array<i32>} : memref<8x1xf32, #tpu.memory_space<vmem>>, vector<8x1xf32>,
    } else {
    }
    %3 = tpu.iota {dimensions = array<i32: 0>} : vector<8x128xi32>
    %c0 = arith.constant 0 : index
    %c0_1 = arith.constant 0 : index
    %4 = vector.load %arg1[%c0, %c0_1] : memref<1x128xi32, #tpu.memory_space<vmem>>, vector<1x128xi32>
    %5 = vector.broadcast %4 : vector<1x128xi32> to vector<8x128xi32>
    %6 = arith.cmpi eq, %5, %3 : vector<8x128xi32>
    %7 = arith.extui %6 : vector<8x128xi1> to vector<8x128xi32>
    %8 = arith.sitofp %7 : vector<8x128xi32> to vector<8x128xf32>
    %9 = arith.truncf %8 : vector<8x128xf32> to vector<8x128xbf16>
    %c0_2 = arith.constant 0 : index
    %c0_3 = arith.constant 0 : index
    %10 = vector.load %arg6[%c0_2, %c0_3] : memref<8x128xf32, #tpu.memory_space<vmem>>, vector<8x128xf32>
    %c0_4 = arith.constant 0 : index
    %c0_5 = arith.constant 0 : index
    %11 = vector.load %arg2[%c0_4, %c0_5] : memref<128x128xbf16, #tpu.memory_space<vmem>>, vector<128x128xbf16>
    %cst = arith.constant dense<0.000000e+00> : vector<8x128xf32>
    %12 = tpu.matmul %9, %11, %cst {dimension_numbers = #tpu.dot_dimension_numbers<[1], [0], [0], [1], [0, 0, 1, 1], [], []>} : vector<8x128xbf16>, vector<128x128xbf16>, vector<8x128xf32> -> vector<8x128xf32>
    %13 = arith.addf %10, %12 : vector<8x128xf32>
    %c0_6 = arith.constant 0 : index
    %c0_7 = arith.constant 0 : index
    %14 = vector.load %arg6[%c0_6, %c0_7] : memref<8x128xf32, #tpu.memory_space<vmem>>, vector<8x128xf32>
    tpu.vector_store %arg6[%c0_6, %c0_7], %13 {strides = array<i32>} : memref<8x128xf32, #tpu.memory_space<vmem>>, vector<8x128xf32>,
    %c0_i32_8 = arith.constant 0 : i32
    %15 = arith.cmpi eq, %arg0, %c0_i32_8 : i32
    %16 = arith.extui %15 : i1 to i32
    %c0_i32_9 = arith.constant 0 : i32
    %17 = arith.cmpi ne, %16, %c0_i32_9 : i32
    scf.if %17 {
      %c0_10 = arith.constant 0 : index
      %c0_11 = arith.constant 0 : index
      %18 = vector.load %arg6[%c0_10, %c0_11] : memref<8x128xf32, #tpu.memory_space<vmem>>, vector<8x128xf32>
      %c0_12 = arith.constant 0 : index
      %c0_13 = arith.constant 0 : index
      %19 = vector.load %arg3[%c0_12, %c0_13] : memref<128x128xf32, #tpu.memory_space<vmem>>, vector<128x128xf32>
      %cst_14 = arith.constant dense<0.000000e+00> : vector<8x128xf32>
      %20 = tpu.matmul %18, %19, %cst_14 {dimension_numbers = #tpu.dot_dimension_numbers<[1], [0], [0], [1], [0, 0, 1, 1], [], []>} : vector<8x128xf32>, vector<128x128xf32>, vector<8x128xf32> -> vector<8x128xf32>
      %c0_15 = arith.constant 0 : index
      %c0_16 = arith.constant 0 : index
      %21 = vector.load %arg4[%c0_15, %c0_16] : memref<1x128xf32, #tpu.memory_space<vmem>>, vector<1x128xf32>
      %22 = vector.broadcast %21 : vector<1x128xf32> to vector<8x128xf32>
      %23 = arith.addf %20, %22 : vector<8x128xf32>
      %c0_17 = arith.constant 0 : index
      %c0_18 = arith.constant 0 : index
      %24 = vector.load %arg5[%c0_17, %c0_18] : memref<8x128xf32, #tpu.memory_space<vmem>>, vector<8x128xf32>
      tpu.vector_store %arg5[%c0_17, %c0_18], %23 {strides = array<i32>} : memref<8x128xf32, #tpu.memory_space<vmem>>, vector<8x128xf32>,
    } else {
    }
    return
  }
  func.func @transform_0(%arg0: i32) -> (i32, i32) {
    %c0_i32 = arith.constant 0 : i32
    %c0_i32_0 = arith.constant 0 : i32
    return %c0_i32, %arg0 : i32, i32
  }
  func.func @transform_1(%arg0: i32) -> (i32, i32) {
    %c0_i32 = arith.constant 0 : i32
    %c0_i32_0 = arith.constant 0 : i32
    return %arg0, %c0_i32 : i32, i32
  }
  func.func @transform_2(%arg0: i32) -> (i32, i32) {
    %c0_i32 = arith.constant 0 : i32
    %c0_i32_0 = arith.constant 0 : i32
    %c0_i32_1 = arith.constant 0 : i32
    return %c0_i32, %c0_i32_0 : i32, i32
  }
  func.func @transform_3(%arg0: i32) -> (i32, i32) {
    %c0_i32 = arith.constant 0 : i32
    %c0_i32_0 = arith.constant 0 : i32
    %c0_i32_1 = arith.constant 0 : i32
    return %c0_i32, %c0_i32_0 : i32, i32
  }
  func.func @transform_4(%arg0: i32) -> (i32, i32) {
    %c0_i32 = arith.constant 0 : i32
    %c0_i32_0 = arith.constant 0 : i32
    %c0_i32_1 = arith.constant 0 : i32
    return %c0_i32, %c0_i32_0 : i32, i32
  }
}

</mosaic_0001>

<bundles_post_ra>
// kernel: gnn_forward_prepared.5
= control target key start
LH: loop header
LB: loop body
LE: loop exit
PB: predicated region body
PF: predicated region fallthrough
CT: control target
= control target key end

     0   :  { %v375_v0 = vmov 0.0   ;;  %vm376_vm0 = vmmov 0   ;;  %v377_v2 = vmov 0.0|0.0   ;;  %v25_v19 = vlaneseq  ;;  %s493_s1 = inlined_call_operand.vmem [shape: bf16[128,128], index: 1, kind: input, shape index: {}]   ;;  %s494_s2 = inlined_call_operand.vmem [shape: f32[128,128], index: 2, kind: input, shape index: {}]   ;;  %s495_s0 = inlined_call_operand.vmem [shape: s32[1,128], index: 0, kind: input, shape index: {}]   ;;  %s496_s3 = inlined_call_operand.vmem [shape: f32[1,128], index: 3, kind: input, shape index: {}]   ;;  %s497_s4 = inlined_call_operand.vmem [shape: f32[8,128], index: 4, kind: output, shape index: {}]  }
   0x1   :  { %284 = vmatprep.subr.bf16.mxu0 %v375_v0  ;;  %v367_v1 = vld [vmem:[%s493_s1] sm:$0xff]   ;;  %300 = vmatprep.mubr.msk.bf16.mxu0 %vm376_vm0, %v375_v0  ;;  %v368_v3 = vld [vmem:[%s493_s1 + $0x8] sm:$0xff]   ;;  %v369_v4 = vld [vmem:[%s493_s1 + $0x10] sm:$0xff]   ;;  %v378_v36 = vmov 1.0|1.0  }
   0x2   :  { %339 = vmatprep.subr.bf16.mxu1 %v377_v2  ;;  %336 = vmatprep.mubr.msk.f32.mxu1 %vm376_vm0, %v375_v0  ;;  %v147_v5 = vld [vmem:[%s494_s2] sm:$0xff]  ;;  %v148_v6 = vld [vmem:[%s494_s2 + $0x8] sm:$0xff]  ;;  %v149_v8 = vld [vmem:[%s494_s2 + $0x10] sm:$0xff]  ;;  %v26_v24 = vshrl.u32 %v25_v19, 7 }
   0x3   :  { %285 = vmatpush3.bf16.msra.mxu0 %v367_v1  ;;  %v340_v7 = vpack.c.bf16 %v148_v6, %v147_v5  ;;  %v150_v9 = vld [vmem:[%s494_s2 + $0x18] sm:$0xff]  ;;  %v151_v12 = vld [vmem:[%s494_s2 + $0x20] sm:$0xff]  ;;  %v152_v13 = vld [vmem:[%s494_s2 + $0x28] sm:$0xff] }
   0x4   :  { %286 = vmatprep.subr.bf16.mxu0 %v375_v0  ;;  %v370_v10 = vld [vmem:[%s493_s1 + $0x18] sm:$0xff]   ;;  %v343_v11 = vpack.c.bf16 %v150_v9, %v149_v8  ;;  %v371_v14 = vld [vmem:[%s493_s1 + $0x20] sm:$0xff]   ;;  %v346_v15 = vpack.c.bf16 %v152_v13, %v151_v12  ;;  %v153_v16 = vld [vmem:[%s494_s2 + $0x30] sm:$0xff] }
   0x5   :  { %341 = vmatpush3.bf16.msra.mxu1 %v340_v7  ;;  %v154_v17 = vld [vmem:[%s494_s2 + $0x38] sm:$0xff]  ;;  %v372_v18 = vld [vmem:[%s493_s1 + $0x28] sm:$0xff]   ;;  %v155_v21 = vld [vmem:[%s494_s2 + $0x40] sm:$0xff] }
   0x6   :  { %342 = vmatprep.subr.bf16.mxu1 %v377_v2  ;;  %v349_v20 = vpack.c.bf16 %v154_v17, %v153_v16  ;;  %v156_v22 = vld [vmem:[%s494_s2 + $0x48] sm:$0xff]  ;;  %v373_v23 = vld [vmem:[%s493_s1 + $0x30] sm:$0xff]   ;;  %v245_v26 = vld [vmem:[%s495_s0] ss:$0 sm:$0xff] }
   0x7   :  { %287 = vmatpush3.bf16.msra.mxu0 %v368_v3  ;;  %v352_v25 = vpack.c.bf16 %v156_v22, %v155_v21  ;;  %v157_v27 = vld [vmem:[%s494_s2 + $0x50] sm:$0xff]  ;;  %v158_v28 = vld [vmem:[%s494_s2 + $0x58] sm:$0xff]  ;;  %vm32_vm1 = vcmp.eq.s32.totalorder %v245_v26, %v26_v24  ;;  %v159_v31 = vld [vmem:[%s494_s2 + $0x60] sm:$0xff] }
   0x8   :  { %288 = vmatprep.subr.bf16.mxu0 %v375_v0  ;;  %v374_v29 = vld [vmem:[%s493_s1 + $0x38] sm:$0xff]   ;;  %v355_v30 = vpack.c.bf16 %v158_v28, %v157_v27  ;;  %v160_v32 = vld [vmem:[%s494_s2 + $0x68] sm:$0xff]  ;;  %vm255_vm2 = vmpackc.low %vm32_vm1, %vm32_vm1 }
   0x9   :  { %344 = vmatpush3.bf16.msra.mxu1 %v343_v11  ;;  %v358_v33 = vpack.c.bf16 %v160_v32, %v159_v31  ;;  %v161_v34 = vld [vmem:[%s494_s2 + $0x70] sm:$0xff]  ;;  %v162_v35 = vld [vmem:[%s494_s2 + $0x78] sm:$0xff]  ;;  %v257_v42 = vld [vmem:[%s496_s3] ss:$0 sm:$0xff] }
   0xa   :  { %345 = vmatprep.subr.bf16.mxu1 %v377_v2  ;;  %v361_v37 = vpack.c.bf16 %v162_v35, %v161_v34 }
   0xb   :  { %289 = vmatpush3.bf16.msra.mxu0 %v369_v4 }
   0xc   :  { %290 = vmatprep.subr.bf16.mxu0 %v375_v0 }
   0xd   :  { %347 = vmatpush3.bf16.msra.mxu1 %v346_v15 }
   0xe   :  { %348 = vmatprep.subr.bf16.mxu1 %v377_v2 }
   0xf   :  { %291 = vmatpush3.bf16.msra.mxu0 %v370_v10 }
  0x10   :  { %292 = vmatprep.subr.bf16.mxu0 %v375_v0 }
  0x11   :  { %350 = vmatpush3.bf16.msra.mxu1 %v349_v20 }
  0x12   :  { %351 = vmatprep.subr.bf16.mxu1 %v377_v2 }
  0x13   :  { %293 = vmatpush3.bf16.msra.mxu0 %v371_v14 }
  0x14   :  { %294 = vmatprep.subr.bf16.mxu0 %v375_v0 }
  0x15   :  { %353 = vmatpush3.bf16.msra.mxu1 %v352_v25 }
  0x16   :  { %354 = vmatprep.subr.bf16.mxu1 %v377_v2 }
  0x17   :  { %295 = vmatpush3.bf16.msra.mxu0 %v372_v18 }
  0x18   :  { %296 = vmatprep.subr.bf16.mxu0 %v375_v0 }
  0x19   :  { %356 = vmatpush3.bf16.msra.mxu1 %v355_v30 }
  0x1a   :  { %357 = vmatprep.subr.bf16.mxu1 %v377_v2 }
  0x1b   :  { %297 = vmatpush3.bf16.msra.mxu0 %v373_v23 }
  0x1c   :  { %298 = vmatprep.subr.bf16.mxu0 %v375_v0 }
  0x1d   :  { %359 = vmatpush3.bf16.msra.mxu1 %v358_v33 }
  0x1e   :  { %360 = vmatprep.subr.bf16.mxu1 %v377_v2 }
  0x1f   :  { %299 = vmatpush3.bf16.msra.mxu0 %v374_v29 }
  0x21   :  { %362 = vmatpush3.bf16.msra.mxu1 %v361_v37 }
  0x22   :  { %301 = vmatmul.mubr.msk.bf16.vlgmr.msra.gmra.mrb[0].mxu0 %vm255_vm2, %v378_v36 }
  0xf5   :  { %v135_v38 = vpop.f32.mrb[0].mxu0 }
  0xf6   :  { %v302_v39 = vpop.f32.mrb[1].mxu0  ;;  %337 = vmatmul.mubr.f32.vlgmr.msra.gmra.mrb[0].mxu1 %v135_v38 }
  0xf7   :  { %v138_v40 = vpop.f32.mrb[2].mxu0 }
  0xf8   :  { %v303_v41 = vpop.f32.mrb[3].mxu0 }
 0x1c9   :  { %v236_v43 = vpop.f32.mrb[0].mxu1 }
 0x1ca   :  { %v237_v44 = vadd.f32 %v257_v42, %v236_v43  ;;  %v338_v45 = vpop.f32.mrb[1].mxu1 }
 0x1cc   :  { %240 = vst [vmem:[%s497_s4] sm:$0xff] %v237_v44 }

// kernel: gnn_forward_prepared.4
= control target key start
LH: loop header
LB: loop body
LE: loop exit
PB: predicated region body
PF: predicated region fallthrough
CT: control target
= control target key end

     0   :  { %s1524_s1 = inlined_call_operand.vmem [shape: bf16[128,128], index: 1, kind: input, shape index: {}, may-alias: {1,2}]   ;;  %s1525_s3 = inlined_call_operand.vmem [shape: f32[128,1], index: 3, kind: input, shape index: {}]   ;;  %s1526_s0 = inlined_call_operand.vmem [shape: s8[128,128], index: 0, kind: input, shape index: {}]   ;;  %s1527_s5 = inlined_call_operand.vmem [shape: f32[128,128], index: 5, kind: input, shape index: {}]   ;;  %s1528_s4 = inlined_call_operand.vmem [shape: f32[128,128], index: 4, kind: input, shape index: {}]   ;;  %s1529_s2 = inlined_call_operand.vmem [shape: bf16[128,128], index: 2, kind: input, shape index: {}, may-alias: {1,2}]   ;;  %s1530_s6 = inlined_call_operand.vmem [shape: f32[1,128], index: 6, kind: input, shape index: {}]   ;;  %s1531_s7 = inlined_call_operand.vmem [shape: f32[1,128], index: 7, kind: input, shape index: {}]   ;;  %s1532_s8 = inlined_call_operand.vmem [shape: bf16[128,128], index: 8, kind: output, shape index: {}]  }
   0x1   :  { %v1215_v0 = vld [vmem:[%s1524_s1] sm:$0xff]   ;;  %v1216_v1 = vld [vmem:[%s1524_s1 + $0x8] sm:$0xff]   ;;  %v1217_v2 = vld [vmem:[%s1524_s1 + $0x10] sm:$0xff]  }
   0x2   :  { %975 = vmatprep.subr.bf16.mxu0 %v1215_v0  ;;  %v1218_v3 = vld [vmem:[%s1524_s1 + $0x18] sm:$0xff]   ;;  %v1283_v4 = vld [vmem:[%s1526_s0] sm:$0xff]  ;;  %v342_v7 = vld [vmem:[%s1527_s5 + $0x8] sm:$0xff] }
   0x3   :  { %976 = vmatpush3.bf16.msra.mxu0 %v1215_v0  ;;  %v54_v5 = vunpack.c.l.s8.bf16 %v1283_v4  ;;  %v341_v6 = vld [vmem:[%s1527_s5] sm:$0xff]  ;;  %v343_v8 = vld [vmem:[%s1527_s5 + $0x10] sm:$0xff]  ;;  %v344_v10 = vld [vmem:[%s1527_s5 + $0x18] sm:$0xff]  ;;  %v55_v36 = vunpack.c.h.s8.bf16 %v1283_v4 }
   0x4   :  { %977 = vmatprep.subr.bf16.mxu0 %v1216_v1  ;;  %v1119_v9 = vpack.c.bf16 %v342_v7, %v341_v6  ;;  %v1219_v11 = vld [vmem:[%s1524_s1 + $0x20] sm:$0xff]   ;;  %v1123_v12 = vpack.c.bf16 %v344_v10, %v343_v8  ;;  %v346_v14 = vld [vmem:[%s1527_s5 + $0x28] sm:$0xff]  ;;  %v347_v17 = vld [vmem:[%s1527_s5 + $0x30] sm:$0xff] }
   0x5   :  { %991 = vmatprep.mubr.bf16.mxu0 %v54_v5  ;;  %v345_v13 = vld [vmem:[%s1527_s5 + $0x20] sm:$0xff]  ;;  %v1220_v16 = vld [vmem:[%s1524_s1 + $0x28] sm:$0xff]   ;;  %v348_v18 = vld [vmem:[%s1527_s5 + $0x38] sm:$0xff] }
   0x6   :  { %1120 = vmatprep.subr.bf16.mxu1 %v1119_v9  ;;  %v1127_v15 = vpack.c.bf16 %v346_v14, %v345_v13  ;;  %v1131_v19 = vpack.c.bf16 %v348_v18, %v347_v17  ;;  %v1221_v20 = vld [vmem:[%s1524_s1 + $0x30] sm:$0xff]   ;;  %v349_v21 = vld [vmem:[%s1527_s5 + $0x40] sm:$0xff]  ;;  %v350_v22 = vld [vmem:[%s1527_s5 + $0x48] sm:$0xff] }
   0x7   :  { %978 = vmatpush3.bf16.msra.mxu0 %v1216_v1  ;;  %1122 = vmatpush3.bf16.msra.mxu1 %v1119_v9  ;;  %v1135_v23 = vpack.c.bf16 %v350_v22, %v349_v21  ;;  %v1222_v24 = vld [vmem:[%s1524_s1 + $0x38] sm:$0xff]   ;;  %v351_v25 = vld [vmem:[%s1527_s5 + $0x50] sm:$0xff]  ;;  %v325_v27 = vld [vmem:[%s1528_s4] sm:$0xff] }
   0x8   :  { %979 = vmatprep.subr.bf16.mxu0 %v1217_v2  ;;  %1124 = vmatprep.subr.bf16.mxu1 %v1123_v12  ;;  %v352_v26 = vld [vmem:[%s1527_s5 + $0x58] sm:$0xff]  ;;  %v326_v28 = vld [vmem:[%s1528_s4 + $0x8] sm:$0xff]  ;;  %v327_v32 = vld [vmem:[%s1528_s4 + $0x10] sm:$0xff] }
   0x9   :  { %v1139_v29 = vpack.c.bf16 %v352_v26, %v351_v25  ;;  %v51_v30 = vld [vmem:[%s1526_s0 + $0x8] sm:$0xff]  ;;  %v1343_v31 = vpack.c.bf16 %v326_v28, %v325_v27  ;;  %v328_v33 = vld [vmem:[%s1528_s4 + $0x18] sm:$0xff]  ;;  %v353_v34 = vld [vmem:[%s1527_s5 + $0x60] sm:$0xff] }
   0xa   :  { %v354_v35 = vld [vmem:[%s1527_s5 + $0x68] sm:$0xff]  ;;  %v56_v37 = vunpack.c.l.s8.bf16 %v51_v30  ;;  %v1359_v38 = vpack.c.bf16 %v328_v33, %v327_v32  ;;  %v355_v40 = vld [vmem:[%s1527_s5 + $0x70] sm:$0xff]  ;;  %v356_v41 = vld [vmem:[%s1527_s5 + $0x78] sm:$0xff]  ;;  %v57_v49 = vunpack.c.h.s8.bf16 %v51_v30 }
   0xb   :  { %980 = vmatpush3.bf16.msra.mxu0 %v1217_v2  ;;  %1126 = vmatpush3.bf16.msra.mxu1 %v1123_v12  ;;  %v1143_v39 = vpack.c.bf16 %v354_v35, %v353_v34  ;;  %v329_v42 = vld [vmem:[%s1528_s4 + $0x20] sm:$0xff]  ;;  %v330_v43 = vld [vmem:[%s1528_s4 + $0x28] sm:$0xff]  ;;  %v1147_v44 = vpack.c.bf16 %v356_v41, %v355_v40  ;;  %v52_v45 = vld [vmem:[%s1526_s0 + $0x10] sm:$0xff] }
   0xc   :  { %981 = vmatprep.subr.bf16.mxu0 %v1218_v3  ;;  %1128 = vmatprep.subr.bf16.mxu1 %v1127_v15  ;;  %v1378_v46 = vpack.c.bf16 %v330_v43, %v329_v42  ;;  %v331_v47 = vld [vmem:[%s1528_s4 + $0x30] sm:$0xff]  ;;  %v332_v48 = vld [vmem:[%s1528_s4 + $0x38] sm:$0xff]  ;;  %v58_v50 = vunpack.c.l.s8.bf16 %v52_v45  ;;  %v333_v52 = vld [vmem:[%s1528_s4 + $0x40] sm:$0xff]  ;;  %v59_v58 = vunpack.c.h.s8.bf16 %v52_v45 }
   0xd   :  { %v1388_v51 = vpack.c.bf16 %v332_v48, %v331_v47  ;;  %v334_v53 = vld [vmem:[%s1528_s4 + $0x48] sm:$0xff]  ;;  %v53_v54 = vld [vmem:[%s1526_s0 + $0x18] sm:$0xff]  ;;  %v335_v56 = vld [vmem:[%s1528_s4 + $0x50] sm:$0xff] }
   0xe   :  { %v1401_v55 = vpack.c.bf16 %v334_v53, %v333_v52  ;;  %v336_v57 = vld [vmem:[%s1528_s4 + $0x58] sm:$0xff]  ;;  %v60_v59 = vunpack.c.l.s8.bf16 %v53_v54  ;;  %v337_v61 = vld [vmem:[%s1528_s4 + $0x60] sm:$0xff]  ;;  %v338_v62 = vld [vmem:[%s1528_s4 + $0x68] sm:$0xff]  ;;  %v61_v0 = vunpack.c.h.s8.bf16 %v53_v54  ;;  %v648_v52 = vlaneseq }
   0xf   :  { %982 = vmatpush3.bf16.msra.mxu0 %v1218_v3  ;;  %1130 = vmatpush3.bf16.msra.mxu1 %v1127_v15  ;;  %v1412_v60 = vpack.c.bf16 %v336_v57, %v335_v56  ;;  %v1422_v63 = vpack.c.bf16 %v338_v62, %v337_v61  ;;  %v339_v1 = vld [vmem:[%s1528_s4 + $0x70] sm:$0xff]  ;;  %v340_v2 = vld [vmem:[%s1528_s4 + $0x78] sm:$0xff]  ;;  %v810_v4 = vld [vmem:[%s1529_s2] sm:$0xff]  }
  0x10   :  { %983 = vmatprep.subr.bf16.mxu0 %v1219_v11  ;;  %1132 = vmatprep.subr.bf16.mxu1 %v1131_v19  ;;  %v1433_v3 = vpack.c.bf16 %v340_v2, %v339_v1  ;;  %v811_v5 = vunpack.c.l.bf16 %v810_v4  ;;  %v812_v6 = vunpack.c.h.bf16 %v810_v4  ;;  %v881_v7 = vld [vmem:[%s1529_s2 + $0x8] sm:$0xff]   ;;  %v882_v10 = vld [vmem:[%s1529_s2 + $0x10] sm:$0xff]   ;;  %v883_v13 = vld [vmem:[%s1529_s2 + $0x18] sm:$0xff]   ;;  %v649_v53 = vshrl.u32 %v648_v52, 7 }
  0x11   :  { %v815_v8 = vunpack.c.l.bf16 %v881_v7  ;;  %v816_v9 = vunpack.c.h.bf16 %v881_v7  ;;  %v820_v12 = vunpack.c.h.bf16 %v882_v10  ;;  %v823_v14 = vunpack.c.l.bf16 %v883_v13  ;;  %v885_v34 = vld [vmem:[%s1529_s2 + $0x28] sm:$0xff]   ;;  %v887_v40 = vld [vmem:[%s1529_s2 + $0x38] sm:$0xff]   ;;  %v322_v54 = vld [vmem:[%s1530_s6] sm:$0x1] }
  0x12   :  { %v824_v15 = vunpack.c.h.bf16 %v883_v13  ;;  %v839_v42 = vunpack.c.l.bf16 %v887_v40  ;;  %v840_v43 = vunpack.c.h.bf16 %v887_v40  ;;  %v650_v57 = vsub.s32 0, %v649_v53 }
  0x13   :  { %984 = vmatpush3.bf16.msra.mxu0 %v1219_v11  ;;  %1134 = vmatpush3.bf16.msra.mxu1 %v1131_v19  ;;  %v819_v11 = vunpack.c.l.bf16 %v882_v10 }
  0x14   :  { %985 = vmatprep.subr.bf16.mxu0 %v1220_v16  ;;  %1136 = vmatprep.subr.bf16.mxu1 %v1135_v23 }
  0x17   :  { %986 = vmatpush3.bf16.msra.mxu0 %v1220_v16  ;;  %1138 = vmatpush3.bf16.msra.mxu1 %v1135_v23 }
  0x18   :  { %987 = vmatprep.subr.bf16.mxu0 %v1221_v20  ;;  %1140 = vmatprep.subr.bf16.mxu1 %v1139_v29 }
  0x1b   :  { %988 = vmatpush3.bf16.msra.mxu0 %v1221_v20  ;;  %1142 = vmatpush3.bf16.msra.mxu1 %v1139_v29 }
  0x1c   :  { %989 = vmatprep.subr.bf16.mxu0 %v1222_v24  ;;  %1144 = vmatprep.subr.bf16.mxu1 %v1143_v39 }
  0x1f   :  { %990 = vmatpush3.bf16.msra.mxu0 %v1222_v24  ;;  %1146 = vmatpush3.bf16.msra.mxu1 %v1143_v39 }
  0x20   :  { %1152 = vmatprep.subr.bf16.mxu0 %v1343_v31  ;;  %1148 = vmatprep.subr.bf16.mxu1 %v1147_v44 }
  0x22   :  { %992 = vmatmul.mubr.bf16.vlgmr.msra.gmra.mrb[0].mxu0 %v55_v36  ;;  %v831_v36 = vunpack.c.l.bf16 %v885_v34 }
  0x23   :  { %995 = vmatprep.mubr.bf16.mxu0 %v56_v37  ;;  %1154 = vmatpush3.bf16.msra.mxu0 %v1343_v31  ;;  %v886_v37 = vld [vmem:[%s1529_s2 + $0x30] sm:$0xff]  }
  0x24   :  { %1156 = vmatprep.subr.bf16.mxu0 %v1359_v38  ;;  %1150 = vmatpush3.bf16.msra.mxu1 %v1147_v44  ;;  %v835_v39 = vunpack.c.l.bf16 %v886_v37  ;;  %v836_v41 = vunpack.c.h.bf16 %v886_v37 }
  0x25   :  { %1183 = vmatprep.subr.bf16.mxu1 %v1343_v31 }
  0x27   :  { %1158 = vmatpush3.bf16.msra.mxu0 %v1359_v38 }
  0x28   :  { %1160 = vmatprep.subr.bf16.mxu0 %v1378_v46 }
  0x2a   :  { %996 = vmatmul.mubr.bf16.gmra.mrb[4].mxu0 %v57_v49 }
  0x2b   :  { %999 = vmatprep.mubr.bf16.mxu0 %v58_v50  ;;  %1162 = vmatpush3.bf16.msra.mxu0 %v1378_v46 }
  0x2c   :  { %1164 = vmatprep.subr.bf16.mxu0 %v1388_v51 }
  0x2f   :  { %1166 = vmatpush3.bf16.msra.mxu0 %v1388_v51 }
  0x30   :  { %1168 = vmatprep.subr.bf16.mxu0 %v1401_v55 }
  0x32   :  { %1000 = vmatmul.mubr.bf16.gmra.mrb[8].mxu0 %v59_v58 }
  0x33   :  { %1003 = vmatprep.mubr.bf16.mxu0 %v60_v59  ;;  %1170 = vmatpush3.bf16.msra.mxu0 %v1401_v55 }
  0x34   :  { %1172 = vmatprep.subr.bf16.mxu0 %v1412_v60 }
  0x37   :  { %1174 = vmatpush3.bf16.msra.mxu0 %v1412_v60 }
  0x38   :  { %1176 = vmatprep.subr.bf16.mxu0 %v1422_v63 }
  0x3a   :  { %1004 = vmatmul.mubr.bf16.gmra.mrb[12].mxu0 %v61_v0 }
  0x3b   :  { %1178 = vmatpush3.bf16.msra.mxu0 %v1422_v63  ;;  %1095 = vmatprep.mubr.f32.mxu0 %v811_v5 }
  0x3c   :  { %1180 = vmatprep.subr.bf16.mxu0 %v1433_v3 }
  0x3f   :  { %1182 = vmatpush3.bf16.msra.mxu0 %v1433_v3 }
  0x42   :  { %1096 = vmatmul.mubr.f32.vlgmr.msra.gmra.mrb[16].mxu0 %v812_v6 }
  0x43   :  { %1098 = vmatprep.mubr.f32.mxu0 %v815_v8 }
  0x46   :  { %1099 = vmatmul.mubr.f32.gmra.mrb[18].mxu0 %v816_v9 }
  0x47   :  { %1101 = vmatprep.mubr.f32.mxu0 %v819_v11 }
  0x4a   :  { %1102 = vmatmul.mubr.f32.gmra.mrb[20].mxu0 %v820_v12 }
  0x4b   :  { %1104 = vmatprep.mubr.f32.mxu0 %v823_v14 }
  0x4e   :  { %1105 = vmatmul.mubr.f32.gmra.mrb[22].mxu0 %v824_v15 }
  0xf5   :  { %v993_v16 = vpop.f32.mrb[0].mxu0 }
  0xf6   :  { %v176_v17 = vpop.f32.mrb[1].mxu0 }
  0xf7   :  { %v994_v18 = vpop.f32.mrb[2].mxu0  ;;  %1039 = vmatprep.mubr.f32.mxu1 %v176_v17 }
  0xf8   :  { %v179_v19 = vpop.f32.mrb[3].mxu0 }
  0xf9   :  { %1040 = vmatmul.mubr.f32.vlgmr.msra.gmra.mrb[0].mxu1 %v179_v19 }
  0xfa   :  { %1191 = vmatpush3.bf16.msra.mxu1 %v1343_v31  ;;  %1042 = vmatprep.mubr.f32.mxu1 %v993_v16  ;;  %v884_v31 = vld [vmem:[%s1529_s2 + $0x20] sm:$0xff]  }
  0xfb   :  { %1184 = vmatprep.subr.bf16.mxu1 %v1359_v38  ;;  %v827_v33 = vunpack.c.l.bf16 %v884_v31  ;;  %v828_v35 = vunpack.c.h.bf16 %v884_v31 }
  0xfd   :  { %v997_v20 = vpop.f32.mrb[4].mxu0  ;;  %1043 = vmatmul.mubr.f32.gmra.mrb[2].mxu1 %v994_v18 }
  0xfe   :  { %1192 = vmatpush3.bf16.msra.mxu1 %v1359_v38  ;;  %v192_v21 = vpop.f32.mrb[5].mxu0  ;;  %v832_v38 = vunpack.c.h.bf16 %v885_v34 }
  0xff   :  { %v998_v22 = vpop.f32.mrb[6].mxu0  ;;  %1045 = vmatprep.mubr.f32.mxu1 %v192_v21  ;;  %1185 = vmatprep.subr.bf16.mxu1 %v1378_v46 }
 0x100   :  { %v195_v23 = vpop.f32.mrb[7].mxu0 }
 0x101   :  { %1046 = vmatmul.mubr.f32.gmra.mrb[4].mxu1 %v195_v23 }
 0x102   :  { %1193 = vmatpush3.bf16.msra.mxu1 %v1378_v46  ;;  %1048 = vmatprep.mubr.f32.mxu1 %v997_v20 }
 0x103   :  { %1186 = vmatprep.subr.bf16.mxu1 %v1388_v51 }
 0x105   :  { %v1001_v24 = vpop.f32.mrb[8].mxu0  ;;  %1049 = vmatmul.mubr.f32.gmra.mrb[6].mxu1 %v998_v22 }
 0x106   :  { %1194 = vmatpush3.bf16.msra.mxu1 %v1388_v51  ;;  %v208_v25 = vpop.f32.mrb[9].mxu0 }
 0x107   :  { %v1002_v26 = vpop.f32.mrb[10].mxu0  ;;  %1051 = vmatprep.mubr.f32.mxu1 %v208_v25  ;;  %1187 = vmatprep.subr.bf16.mxu1 %v1401_v55 }
 0x108   :  { %v211_v27 = vpop.f32.mrb[11].mxu0 }
 0x109   :  { %1052 = vmatmul.mubr.f32.gmra.mrb[8].mxu1 %v211_v27 }
 0x10a   :  { %1195 = vmatpush3.bf16.msra.mxu1 %v1401_v55  ;;  %1054 = vmatprep.mubr.f32.mxu1 %v1001_v24  ;;  %v323_v55 = vld [vmem:[%s1531_s7] sm:$0x1] }
 0x10b   :  { %1188 = vmatprep.subr.bf16.mxu1 %v1412_v60  ;;  %v324_v56 = vadd.f32 %v323_v55, %v322_v54 }
 0x10d   :  { %v1005_v28 = vpop.f32.mrb[12].mxu0  ;;  %1055 = vmatmul.mubr.f32.gmra.mrb[10].mxu1 %v1002_v26  ;;  %v1482_v58 = vrot.slane %v324_v56, %v650_v57 }
 0x10e   :  { %1196 = vmatpush3.bf16.msra.mxu1 %v1412_v60  ;;  %v224_v29 = vpop.f32.mrb[13].mxu0 }
 0x10f   :  { %v1006_v30 = vpop.f32.mrb[14].mxu0  ;;  %1057 = vmatprep.mubr.f32.mxu1 %v224_v29  ;;  %1189 = vmatprep.subr.bf16.mxu1 %v1422_v63 }
 0x110   :  { %v227_v32 = vpop.f32.mrb[15].mxu0 }
 0x111   :  { %1058 = vmatmul.mubr.f32.gmra.mrb[12].mxu1 %v227_v32 }
 0x112   :  { %1197 = vmatpush3.bf16.msra.mxu1 %v1422_v63  ;;  %1060 = vmatprep.mubr.f32.mxu1 %v1005_v28 }
 0x113   :  { %1190 = vmatprep.subr.bf16.mxu1 %v1433_v3 }
 0x115   :  { %1061 = vmatmul.mubr.f32.gmra.mrb[14].mxu1 %v1006_v30  ;;  %v1097_v44 = vpop.f32.mrb[16].mxu0 }
 0x116   :  { %1198 = vmatpush3.bf16.msra.mxu1 %v1433_v3  ;;  %1107 = vmatprep.mubr.f32.mxu1 %v827_v33  ;;  %v568_v45 = vpop.f32.mrb[17].mxu0 }
 0x119   :  { %1108 = vmatmul.mubr.f32.vlgmr.msra.gmra.mrb[8].mxu1 %v828_v35  ;;  %v1100_v46 = vpop.f32.mrb[18].mxu0 }
 0x11a   :  { %1110 = vmatprep.mubr.f32.mxu1 %v831_v36  ;;  %v578_v47 = vpop.f32.mrb[19].mxu0 }
 0x11d   :  { %1111 = vmatmul.mubr.f32.gmra.mrb[10].mxu1 %v832_v38  ;;  %v1103_v48 = vpop.f32.mrb[20].mxu0 }
 0x11e   :  { %1113 = vmatprep.mubr.f32.mxu1 %v835_v39  ;;  %v588_v49 = vpop.f32.mrb[21].mxu0 }
 0x121   :  { %1114 = vmatmul.mubr.f32.gmra.mrb[12].mxu1 %v836_v41  ;;  %v1106_v50 = vpop.f32.mrb[22].mxu0 }
 0x122   :  { %1116 = vmatprep.mubr.f32.mxu1 %v839_v42  ;;  %v598_v51 = vpop.f32.mrb[23].mxu0 }
 0x125   :  { %1117 = vmatmul.mubr.f32.gmra.mrb[14].mxu1 %v840_v43 }
 0x1cc   :  { %v1041_v59 = vpop.f32.mrb[0].mxu1 }
 0x1cd   :  { %v574_v60 = vadd.f32 %v1097_v44, %v1041_v59  ;;  %v423_v61 = vpop.f32.mrb[1].mxu1 }
 0x1ce   :  { %v569_v62 = vadd.f32 %v568_v45, %v423_v61 }
 0x1cf   :  { %v654_v63 = vadd.f32 %v1482_v58, %v574_v60 }
 0x1d0   :  { %v653_v0 = vadd.f32 %v1482_v58, %v569_v62  ;;  %v1044_v1 = vpop.f32.mrb[2].mxu1 }
 0x1d1   :  { %v670_v2 = vmax.f32 %v654_v63, 0.0  ;;  %v584_v3 = vadd.f32 %v1100_v46, %v1044_v1  ;;  %v433_v4 = vpop.f32.mrb[3].mxu1 }
 0x1d2   :  { %v669_v5 = vmax.f32 %v653_v0, 0.0  ;;  %v579_v6 = vadd.f32 %v578_v47, %v433_v4 }
 0x1d3   :  { %v656_v7 = vadd.f32 %v1482_v58, %v584_v3 }
 0x1d4   :  { %v844_v8 = vpack.c.bf16 %v670_v2, %v669_v5  ;;  %v655_v9 = vadd.f32 %v1482_v58, %v579_v6  ;;  %v1047_v10 = vpop.f32.mrb[4].mxu1 }
 0x1d5   :  { %v672_v11 = vmax.f32 %v656_v7, 0.0  ;;  %v594_v12 = vadd.f32 %v1103_v48, %v1047_v10  ;;  %v443_v13 = vpop.f32.mrb[5].mxu1 }
 0x1d6   :  { %845 = vst [vmem:[%s1532_s8] sm:$0xff] %v844_v8   ;;  %v671_v14 = vmax.f32 %v655_v9, 0.0  ;;  %v589_v15 = vadd.f32 %v588_v49, %v443_v13 }
 0x1d7   :  { %v658_v16 = vadd.f32 %v1482_v58, %v594_v12 }
 0x1d8   :  { %v849_v17 = vpack.c.bf16 %v672_v11, %v671_v14  ;;  %v657_v18 = vadd.f32 %v1482_v58, %v589_v15  ;;  %v1050_v19 = vpop.f32.mrb[6].mxu1 }
 0x1d9   :  { %v674_v20 = vmax.f32 %v658_v16, 0.0  ;;  %v604_v21 = vadd.f32 %v1106_v50, %v1050_v19  ;;  %v453_v22 = vpop.f32.mrb[7].mxu1 }
 0x1da   :  { %888 = vst [vmem:[%s1532_s8 + $0x8] sm:$0xff] %v849_v17   ;;  %v673_v23 = vmax.f32 %v657_v18, 0.0  ;;  %v599_v24 = vadd.f32 %v598_v51, %v453_v22 }
 0x1db   :  { %v660_v25 = vadd.f32 %v1482_v58, %v604_v21 }
 0x1dc   :  { %v854_v26 = vpack.c.bf16 %v674_v20, %v673_v23  ;;  %v659_v27 = vadd.f32 %v1482_v58, %v599_v24 }
 0x1dd   :  { %v676_v28 = vmax.f32 %v660_v25, 0.0 }
 0x1de   :  { %889 = vst [vmem:[%s1532_s8 + $0x10] sm:$0xff] %v854_v26   ;;  %v675_v29 = vmax.f32 %v659_v27, 0.0 }
 0x1e0   :  { %v859_v30 = vpack.c.bf16 %v676_v28, %v675_v29 }
 0x1e2   :  { %890 = vst [vmem:[%s1532_s8 + $0x18] sm:$0xff] %v859_v30  }
 0x1ec   :  { %v1109_v31 = vpop.f32.mrb[8].mxu1 }
 0x1ed   :  { %v662_v32 = vadd.f32 %v1109_v31, %v1482_v58  ;;  %v608_v33 = vpop.f32.mrb[9].mxu1 }
 0x1ee   :  { %v661_v34 = vadd.f32 %v1482_v58, %v608_v33 }
 0x1ef   :  { %v678_v35 = vmax.f32 %v662_v32, 0.0 }
 0x1f0   :  { %v677_v36 = vmax.f32 %v661_v34, 0.0  ;;  %v1112_v37 = vpop.f32.mrb[10].mxu1 }
 0x1f1   :  { %v664_v38 = vadd.f32 %v1112_v37, %v1482_v58  ;;  %v618_v39 = vpop.f32.mrb[11].mxu1 }
 0x1f2   :  { %v864_v40 = vpack.c.bf16 %v678_v35, %v677_v36  ;;  %v663_v41 = vadd.f32 %v1482_v58, %v618_v39 }
 0x1f3   :  { %v680_v42 = vmax.f32 %v664_v38, 0.0 }
 0x1f4   :  { %891 = vst [vmem:[%s1532_s8 + $0x20] sm:$0xff] %v864_v40   ;;  %v679_v43 = vmax.f32 %v663_v41, 0.0  ;;  %v1115_v44 = vpop.f32.mrb[12].mxu1 }
 0x1f5   :  { %v666_v45 = vadd.f32 %v1115_v44, %v1482_v58  ;;  %v628_v46 = vpop.f32.mrb[13].mxu1 }
 0x1f6   :  { %v869_v47 = vpack.c.bf16 %v680_v42, %v679_v43  ;;  %v665_v48 = vadd.f32 %v1482_v58, %v628_v46 }
 0x1f7   :  { %v682_v49 = vmax.f32 %v666_v45, 0.0 }
 0x1f8   :  { %892 = vst [vmem:[%s1532_s8 + $0x28] sm:$0xff] %v869_v47   ;;  %v681_v50 = vmax.f32 %v665_v48, 0.0  ;;  %v1118_v51 = vpop.f32.mrb[14].mxu1 }
 0x1f9   :  { %v668_v52 = vadd.f32 %v1118_v51, %v1482_v58  ;;  %v638_v53 = vpop.f32.mrb[15].mxu1 }
 0x1fa   :  { %v874_v54 = vpack.c.bf16 %v682_v49, %v681_v50  ;;  %v667_v55 = vadd.f32 %v1482_v58, %v638_v53 }
 0x1fb   :  { %v684_v56 = vmax.f32 %v668_v52, 0.0 }
 0x1fc   :  { %893 = vst [vmem:[%s1532_s8 + $0x30] sm:$0xff] %v874_v54   ;;  %v683_v57 = vmax.f32 %v667_v55, 0.0 }
 0x1fe   :  { %v879_v59 = vpack.c.bf16 %v684_v56, %v683_v57 }
 0x200   :  { %894 = vst [vmem:[%s1532_s8 + $0x38] sm:$0xff] %v879_v59  }

// kernel: gnn_forward_prepared.3
= control target key start
LH: loop header
LB: loop body
LE: loop exit
PB: predicated region body
PF: predicated region fallthrough
CT: control target
= control target key end

     0   :  { %13 = vsyncpa [#allocation4], 0  ;;  %s1538_s0 = inlined_call_operand.vmem [shape: s8[128,128], index: 0, kind: input, shape index: {}]   ;;  %s1539_s1 = inlined_call_operand.vmem [shape: bf16[128,128], index: 1, kind: input, shape index: {}, may-alias: {1,2}]   ;;  %s1540_s2 = inlined_call_operand.vmem [shape: bf16[128,128], index: 2, kind: input, shape index: {}, may-alias: {1,2}]   ;;  %s1541_s3 = inlined_call_operand.vmem [shape: f32[128,1], index: 3, kind: input, shape index: {}]   ;;  %s1542_s4 = inlined_call_operand.hbm [shape: f32[128,128], index: 4, kind: input, shape index: {}]   ;;  %s1543_s5 = inlined_call_operand.hbm [shape: f32[128,128], index: 5, kind: input, shape index: {}]   ;;  %s1544_s6 = inlined_call_operand.vmem [shape: f32[1,128], index: 6, kind: input, shape index: {}]   ;;  %s1545_s7 = inlined_call_operand.vmem [shape: f32[1,128], index: 7, kind: input, shape index: {}]   ;;  %s1546_s8 = inlined_call_operand.vmem [shape: bf16[128,128], index: 8, kind: output, shape index: {}]  }
   0x1   :  { %14 = vsyncpa [#allocation6], 0  ;;  %s1305_s27 = smov [#allocation3]   ;;  %s1257_s30 = scalar_lea.hbm %s1542_s4, 2048 }
   0x2   :  { %s28_s28 = sshll.u32 %s1305_s27, 4  ;;  %p1258_p0 = scmp.ne.s32.totalorder %s1542_s4, %s1257_s30  ;;  %s29_s28 = int_to_ptr.vmem [resolvable:$true] %s28_s28 }
   0x3   :  { %p1261_p1 = scmp.lt.u32.totalorder %s1257_s30, %s1542_s4 }
   0x5   :  { %p1263_p2 = pnand %p1261_p1, %p1258_p0 }
   0x7   :  { %1266 = shalt.err (!%p1263_p2)
}
   0x8   :  { %s1267_s13 = scalar_lea.vmem %s29_s28, 2048  ;;  %p1272_p4 = scmp.lt.s32.totalorder %s29_s28, %s29_s28 }
   0x9   :  { %p1268_p3 = scmp.ne.s32.totalorder %s29_s28, %s1267_s13  ;;  %p1273_p5 = scmp.lt.s32.totalorder %s1267_s13, %s1267_s13 }
   0xb   :  { %p1274_p6 = por %p1273_p5, %p1272_p4 }
   0xd   :  { %p1275_p7 = pnand %p1274_p6, %p1268_p3 }
   0xf   :  { %1278 = shalt.err (!%p1275_p7)
}
  0x10   :  { %s1306_s14 = smov 128   ;;  %s1307_s15 = smov 8  }
  0x11   :  { %34 = dma.hbm_to_vmem [thread:$0]  %s1542_s4, 2048, %s29_s28, [#allocation4], %s1306_s14, %s1306_s14, %s1307_s15  }
  0x12   :  { %s1308_s18 = smov [#allocation5]   ;;  %s1279_s22 = scalar_lea.hbm %s1543_s5, 2048 }
  0x13   :  { %s40_s19 = sshll.u32 %s1308_s18, 4  ;;  %p1280_p8 = scmp.ne.s32.totalorder %s1543_s5, %s1279_s22  ;;  %s41_s19 = int_to_ptr.vmem [resolvable:$true] %s40_s19 }
  0x14   :  { %p1283_p9 = scmp.lt.u32.totalorder %s1279_s22, %s1543_s5 }
  0x16   :  { %p1285_p10 = pnand %p1283_p9, %p1280_p8 }
  0x18   :  { %1288 = shalt.err (!%p1285_p10)
}
  0x19   :  { %s1289_s27 = scalar_lea.vmem %s41_s19, 2048  ;;  %p1294_p12 = scmp.lt.s32.totalorder %s41_s19, %s41_s19 }
  0x1a   :  { %p1290_p11 = scmp.ne.s32.totalorder %s41_s19, %s1289_s27  ;;  %p1295_p13 = scmp.lt.s32.totalorder %s1289_s27, %s1289_s27 }
  0x1c   :  { %p1296_p0 = por %p1295_p13, %p1294_p12 }
  0x1e   :  { %p1297_p1 = pnand %p1296_p0, %p1290_p11 }
  0x20   :  { %1300 = shalt.err (!%p1297_p1)
}
  0x21   :  { %46 = dma.hbm_to_vmem [thread:$0]  %s1543_s5, 2048, %s41_s19, [#allocation6], %s1306_s14, %s1306_s14, %s1307_s15  }
  0x22   :  { %1301 = dma.done.wait [#allocation4], 2048  }
  0x23   :  { %1302 = vsyncadd [#allocation4], 4294965248 }
  0x24   :  { %1303 = dma.done.wait [#allocation6], 2048  }
  0x25   :  { %1304 = vsyncadd [#allocation6], 4294965248  ;;  %v1249_v0 = vld [vmem:[%s1539_s1] sm:$0xff]   ;;  %v1250_v1 = vld [vmem:[%s1539_s1 + $0x8] sm:$0xff]  }
  0x26   :  { %1005 = vmatprep.subr.bf16.mxu0 %v1249_v0  ;;  %v1251_v2 = vld [vmem:[%s1539_s1 + $0x10] sm:$0xff]   ;;  %v1252_v3 = vld [vmem:[%s1539_s1 + $0x18] sm:$0xff]   ;;  %v1393_v4 = vld [vmem:[%s1538_s0] sm:$0xff] }
  0x27   :  { %1006 = vmatpush3.bf16.msra.mxu0 %v1249_v0  ;;  %v82_v5 = vunpack.c.l.s8.bf16 %v1393_v4  ;;  %v369_v6 = vld [vmem:[#allocation5] sm:$0xff]  ;;  %v370_v7 = vld [vmem:[#allocation5 + $0x8] sm:$0xff]  ;;  %v371_v8 = vld [vmem:[#allocation5 + $0x10] sm:$0xff]  ;;  %v83_v36 = vunpack.c.h.s8.bf16 %v1393_v4 }
  0x28   :  { %1007 = vmatprep.subr.bf16.mxu0 %v1250_v1  ;;  %v1149_v9 = vpack.c.bf16 %v370_v7, %v369_v6  ;;  %v372_v10 = vld [vmem:[#allocation5 + $0x18] sm:$0xff]  ;;  %v1253_v11 = vld [vmem:[%s1539_s1 + $0x20] sm:$0xff]   ;;  %v374_v14 = vld [vmem:[#allocation5 + $0x28] sm:$0xff] }
  0x29   :  { %1021 = vmatprep.mubr.bf16.mxu0 %v82_v5  ;;  %v1153_v12 = vpack.c.bf16 %v372_v10, %v371_v8  ;;  %v373_v13 = vld [vmem:[#allocation5 + $0x20] sm:$0xff]  ;;  %v1254_v16 = vld [vmem:[%s1539_s1 + $0x28] sm:$0xff]   ;;  %v375_v17 = vld [vmem:[#allocation5 + $0x30] sm:$0xff] }
  0x2a   :  { %1150 = vmatprep.subr.bf16.mxu1 %v1149_v9  ;;  %v1157_v15 = vpack.c.bf16 %v374_v14, %v373_v13  ;;  %v376_v18 = vld [vmem:[#allocation5 + $0x38] sm:$0xff]  ;;  %v1255_v20 = vld [vmem:[%s1539_s1 + $0x30] sm:$0xff]   ;;  %v377_v21 = vld [vmem:[#allocation5 + $0x40] sm:$0xff] }
  0x2b   :  { %1008 = vmatpush3.bf16.msra.mxu0 %v1250_v1  ;;  %1152 = vmatpush3.bf16.msra.mxu1 %v1149_v9  ;;  %v1161_v19 = vpack.c.bf16 %v376_v18, %v375_v17  ;;  %v378_v22 = vld [vmem:[#allocation5 + $0x48] sm:$0xff]  ;;  %v1256_v24 = vld [vmem:[%s1539_s1 + $0x38] sm:$0xff]   ;;  %v379_v25 = vld [vmem:[#allocation5 + $0x50] sm:$0xff] }
  0x2c   :  { %1009 = vmatprep.subr.bf16.mxu0 %v1251_v2  ;;  %1154 = vmatprep.subr.bf16.mxu1 %v1153_v12  ;;  %v1165_v23 = vpack.c.bf16 %v378_v22, %v377_v21  ;;  %v380_v26 = vld [vmem:[#allocation5 + $0x58] sm:$0xff]  ;;  %v353_v27 = vld [vmem:[#allocation3] sm:$0xff]  ;;  %v354_v28 = vld [vmem:[#allocation3 + $0x8] sm:$0xff] }
  0x2d   :  { %v1169_v29 = vpack.c.bf16 %v380_v26, %v379_v25  ;;  %v79_v30 = vld [vmem:[%s1538_s0 + $0x8] sm:$0xff]  ;;  %v1411_v31 = vpack.c.bf16 %v354_v28, %v353_v27  ;;  %v355_v32 = vld [vmem:[#allocation3 + $0x10] sm:$0xff]  ;;  %v356_v33 = vld [vmem:[#allocation3 + $0x18] sm:$0xff] }
  0x2e   :  { %v381_v34 = vld [vmem:[#allocation5 + $0x60] sm:$0xff]  ;;  %v382_v35 = vld [vmem:[#allocation5 + $0x68] sm:$0xff]  ;;  %v84_v37 = vunpack.c.l.s8.bf16 %v79_v30  ;;  %v1415_v38 = vpack.c.bf16 %v356_v33, %v355_v32  ;;  %v383_v40 = vld [vmem:[#allocation5 + $0x70] sm:$0xff]  ;;  %v85_v49 = vunpack.c.h.s8.bf16 %v79_v30 }
  0x2f   :  { %1010 = vmatpush3.bf16.msra.mxu0 %v1251_v2  ;;  %1156 = vmatpush3.bf16.msra.mxu1 %v1153_v12  ;;  %v1173_v39 = vpack.c.bf16 %v382_v35, %v381_v34  ;;  %v384_v41 = vld [vmem:[#allocation5 + $0x78] sm:$0xff]  ;;  %v357_v42 = vld [vmem:[#allocation3 + $0x20] sm:$0xff]  ;;  %v358_v43 = vld [vmem:[#allocation3 + $0x28] sm:$0xff] }
  0x30   :  { %1011 = vmatprep.subr.bf16.mxu0 %v1252_v3  ;;  %1158 = vmatprep.subr.bf16.mxu1 %v1157_v15  ;;  %v1177_v44 = vpack.c.bf16 %v384_v41, %v383_v40  ;;  %v80_v45 = vld [vmem:[%s1538_s0 + $0x10] sm:$0xff]  ;;  %v1422_v46 = vpack.c.bf16 %v358_v43, %v357_v42  ;;  %v360_v48 = vld [vmem:[#allocation3 + $0x38] sm:$0xff]  ;;  %v361_v52 = vld [vmem:[#allocation3 + $0x40] sm:$0xff] }
  0x31   :  { %v359_v47 = vld [vmem:[#allocation3 + $0x30] sm:$0xff]  ;;  %v86_v50 = vunpack.c.l.s8.bf16 %v80_v45  ;;  %v362_v53 = vld [vmem:[#allocation3 + $0x48] sm:$0xff]  ;;  %v81_v54 = vld [vmem:[%s1538_s0 + $0x18] sm:$0xff]  ;;  %v87_v58 = vunpack.c.h.s8.bf16 %v80_v45 }
  0x32   :  { %v1426_v51 = vpack.c.bf16 %v360_v48, %v359_v47  ;;  %v1433_v55 = vpack.c.bf16 %v362_v53, %v361_v52  ;;  %v363_v56 = vld [vmem:[#allocation3 + $0x50] sm:$0xff]  ;;  %v364_v57 = vld [vmem:[#allocation3 + $0x58] sm:$0xff]  ;;  %v88_v59 = vunpack.c.l.s8.bf16 %v81_v54  ;;  %v365_v61 = vld [vmem:[#allocation3 + $0x60] sm:$0xff]  ;;  %v89_v0 = vunpack.c.h.s8.bf16 %v81_v54 }
  0x33   :  { %1012 = vmatpush3.bf16.msra.mxu0 %v1252_v3  ;;  %1160 = vmatpush3.bf16.msra.mxu1 %v1157_v15  ;;  %v1438_v60 = vpack.c.bf16 %v364_v57, %v363_v56  ;;  %v366_v62 = vld [vmem:[#allocation3 + $0x68] sm:$0xff]  ;;  %v367_v1 = vld [vmem:[#allocation3 + $0x70] sm:$0xff]  ;;  %v368_v2 = vld [vmem:[#allocation3 + $0x78] sm:$0xff]  ;;  %v676_v52 = vlaneseq }
  0x34   :  { %1013 = vmatprep.subr.bf16.mxu0 %v1253_v11  ;;  %1162 = vmatprep.subr.bf16.mxu1 %v1161_v19  ;;  %v1442_v63 = vpack.c.bf16 %v366_v62, %v365_v61  ;;  %v1447_v3 = vpack.c.bf16 %v368_v2, %v367_v1  ;;  %v840_v4 = vld [vmem:[%s1540_s2] sm:$0xff]   ;;  %v911_v7 = vld [vmem:[%s1540_s2 + $0x8] sm:$0xff]   ;;  %v912_v10 = vld [vmem:[%s1540_s2 + $0x10] sm:$0xff]  }
  0x35   :  { %v841_v5 = vunpack.c.l.bf16 %v840_v4  ;;  %v842_v6 = vunpack.c.h.bf16 %v840_v4  ;;  %v845_v8 = vunpack.c.l.bf16 %v911_v7  ;;  %v846_v9 = vunpack.c.h.bf16 %v911_v7  ;;  %v913_v13 = vld [vmem:[%s1540_s2 + $0x18] sm:$0xff]   ;;  %v915_v34 = vld [vmem:[%s1540_s2 + $0x28] sm:$0xff]   ;;  %v350_v54 = vld [vmem:[%s1544_s6] sm:$0x1] }
  0x36   :  { %v850_v12 = vunpack.c.h.bf16 %v912_v10  ;;  %v853_v14 = vunpack.c.l.bf16 %v913_v13  ;;  %v854_v15 = vunpack.c.h.bf16 %v913_v13  ;;  %v917_v40 = vld [vmem:[%s1540_s2 + $0x38] sm:$0xff]   ;;  %v677_v53 = vshrl.u32 %v676_v52, 7 }
  0x37   :  { %1014 = vmatpush3.bf16.msra.mxu0 %v1253_v11  ;;  %1164 = vmatpush3.bf16.msra.mxu1 %v1161_v19  ;;  %v849_v11 = vunpack.c.l.bf16 %v912_v10  ;;  %v869_v42 = vunpack.c.l.bf16 %v917_v40  ;;  %v870_v43 = vunpack.c.h.bf16 %v917_v40 }
  0x38   :  { %1015 = vmatprep.subr.bf16.mxu0 %v1254_v16  ;;  %1166 = vmatprep.subr.bf16.mxu1 %v1165_v23  ;;  %v678_v57 = vsub.s32 0, %v677_v53 }
  0x3b   :  { %1016 = vmatpush3.bf16.msra.mxu0 %v1254_v16  ;;  %1168 = vmatpush3.bf16.msra.mxu1 %v1165_v23 }
  0x3c   :  { %1017 = vmatprep.subr.bf16.mxu0 %v1255_v20  ;;  %1170 = vmatprep.subr.bf16.mxu1 %v1169_v29 }
  0x3f   :  { %1018 = vmatpush3.bf16.msra.mxu0 %v1255_v20  ;;  %1172 = vmatpush3.bf16.msra.mxu1 %v1169_v29 }
  0x40   :  { %1019 = vmatprep.subr.bf16.mxu0 %v1256_v24  ;;  %1174 = vmatprep.subr.bf16.mxu1 %v1173_v39 }
  0x43   :  { %1020 = vmatpush3.bf16.msra.mxu0 %v1256_v24  ;;  %1176 = vmatpush3.bf16.msra.mxu1 %v1173_v39 }
  0x44   :  { %1182 = vmatprep.subr.bf16.mxu0 %v1411_v31  ;;  %1178 = vmatprep.subr.bf16.mxu1 %v1177_v44 }
  0x46   :  { %1022 = vmatmul.mubr.bf16.vlgmr.msra.gmra.mrb[0].mxu0 %v83_v36  ;;  %v861_v36 = vunpack.c.l.bf16 %v915_v34 }
  0x47   :  { %1025 = vmatprep.mubr.bf16.mxu0 %v84_v37  ;;  %1184 = vmatpush3.bf16.msra.mxu0 %v1411_v31  ;;  %v916_v37 = vld [vmem:[%s1540_s2 + $0x30] sm:$0xff]  }
  0x48   :  { %1186 = vmatprep.subr.bf16.mxu0 %v1415_v38  ;;  %1180 = vmatpush3.bf16.msra.mxu1 %v1177_v44  ;;  %v865_v39 = vunpack.c.l.bf16 %v916_v37  ;;  %v866_v41 = vunpack.c.h.bf16 %v916_v37 }
  0x49   :  { %1213 = vmatprep.subr.bf16.mxu1 %v1411_v31 }
  0x4b   :  { %1188 = vmatpush3.bf16.msra.mxu0 %v1415_v38 }
  0x4c   :  { %1190 = vmatprep.subr.bf16.mxu0 %v1422_v46 }
  0x4e   :  { %1026 = vmatmul.mubr.bf16.gmra.mrb[4].mxu0 %v85_v49 }
  0x4f   :  { %1029 = vmatprep.mubr.bf16.mxu0 %v86_v50  ;;  %1192 = vmatpush3.bf16.msra.mxu0 %v1422_v46 }
  0x50   :  { %1194 = vmatprep.subr.bf16.mxu0 %v1426_v51 }
  0x53   :  { %1196 = vmatpush3.bf16.msra.mxu0 %v1426_v51 }
  0x54   :  { %1198 = vmatprep.subr.bf16.mxu0 %v1433_v55 }
  0x56   :  { %1030 = vmatmul.mubr.bf16.gmra.mrb[8].mxu0 %v87_v58 }
  0x57   :  { %1033 = vmatprep.mubr.bf16.mxu0 %v88_v59  ;;  %1200 = vmatpush3.bf16.msra.mxu0 %v1433_v55 }
  0x58   :  { %1202 = vmatprep.subr.bf16.mxu0 %v1438_v60 }
  0x5b   :  { %1204 = vmatpush3.bf16.msra.mxu0 %v1438_v60 }
  0x5c   :  { %1206 = vmatprep.subr.bf16.mxu0 %v1442_v63 }
  0x5e   :  { %1034 = vmatmul.mubr.bf16.gmra.mrb[12].mxu0 %v89_v0 }
  0x5f   :  { %1208 = vmatpush3.bf16.msra.mxu0 %v1442_v63  ;;  %1125 = vmatprep.mubr.f32.mxu0 %v841_v5 }
  0x60   :  { %1210 = vmatprep.subr.bf16.mxu0 %v1447_v3 }
  0x63   :  { %1212 = vmatpush3.bf16.msra.mxu0 %v1447_v3 }
  0x66   :  { %1126 = vmatmul.mubr.f32.vlgmr.msra.gmra.mrb[16].mxu0 %v842_v6 }
  0x67   :  { %1128 = vmatprep.mubr.f32.mxu0 %v845_v8 }
  0x6a   :  { %1129 = vmatmul.mubr.f32.gmra.mrb[18].mxu0 %v846_v9 }
  0x6b   :  { %1131 = vmatprep.mubr.f32.mxu0 %v849_v11 }
  0x6e   :  { %1132 = vmatmul.mubr.f32.gmra.mrb[20].mxu0 %v850_v12 }
  0x6f   :  { %1134 = vmatprep.mubr.f32.mxu0 %v853_v14 }
  0x72   :  { %1135 = vmatmul.mubr.f32.gmra.mrb[22].mxu0 %v854_v15 }
 0x119   :  { %v1023_v16 = vpop.f32.mrb[0].mxu0 }
 0x11a   :  { %v204_v17 = vpop.f32.mrb[1].mxu0 }
 0x11b   :  { %v1024_v18 = vpop.f32.mrb[2].mxu0  ;;  %1069 = vmatprep.mubr.f32.mxu1 %v204_v17 }
 0x11c   :  { %v207_v19 = vpop.f32.mrb[3].mxu0 }
 0x11d   :  { %1070 = vmatmul.mubr.f32.vlgmr.msra.gmra.mrb[0].mxu1 %v207_v19 }
 0x11e   :  { %1221 = vmatpush3.bf16.msra.mxu1 %v1411_v31  ;;  %1072 = vmatprep.mubr.f32.mxu1 %v1023_v16  ;;  %v914_v31 = vld [vmem:[%s1540_s2 + $0x20] sm:$0xff]  }
 0x11f   :  { %1214 = vmatprep.subr.bf16.mxu1 %v1415_v38  ;;  %v857_v33 = vunpack.c.l.bf16 %v914_v31  ;;  %v858_v35 = vunpack.c.h.bf16 %v914_v31 }
 0x121   :  { %v1027_v20 = vpop.f32.mrb[4].mxu0  ;;  %1073 = vmatmul.mubr.f32.gmra.mrb[2].mxu1 %v1024_v18 }
 0x122   :  { %1222 = vmatpush3.bf16.msra.mxu1 %v1415_v38  ;;  %v220_v21 = vpop.f32.mrb[5].mxu0  ;;  %v862_v38 = vunpack.c.h.bf16 %v915_v34 }
 0x123   :  { %v1028_v22 = vpop.f32.mrb[6].mxu0  ;;  %1075 = vmatprep.mubr.f32.mxu1 %v220_v21  ;;  %1215 = vmatprep.subr.bf16.mxu1 %v1422_v46 }
 0x124   :  { %v223_v23 = vpop.f32.mrb[7].mxu0 }
 0x125   :  { %1076 = vmatmul.mubr.f32.gmra.mrb[4].mxu1 %v223_v23 }
 0x126   :  { %1223 = vmatpush3.bf16.msra.mxu1 %v1422_v46  ;;  %1078 = vmatprep.mubr.f32.mxu1 %v1027_v20 }
 0x127   :  { %1216 = vmatprep.subr.bf16.mxu1 %v1426_v51 }
 0x129   :  { %v1031_v24 = vpop.f32.mrb[8].mxu0  ;;  %1079 = vmatmul.mubr.f32.gmra.mrb[6].mxu1 %v1028_v22 }
 0x12a   :  { %1224 = vmatpush3.bf16.msra.mxu1 %v1426_v51  ;;  %v236_v25 = vpop.f32.mrb[9].mxu0 }
 0x12b   :  { %v1032_v26 = vpop.f32.mrb[10].mxu0  ;;  %1081 = vmatprep.mubr.f32.mxu1 %v236_v25  ;;  %1217 = vmatprep.subr.bf16.mxu1 %v1433_v55 }
 0x12c   :  { %v239_v27 = vpop.f32.mrb[11].mxu0 }
 0x12d   :  { %1082 = vmatmul.mubr.f32.gmra.mrb[8].mxu1 %v239_v27 }
 0x12e   :  { %1225 = vmatpush3.bf16.msra.mxu1 %v1433_v55  ;;  %1084 = vmatprep.mubr.f32.mxu1 %v1031_v24  ;;  %v351_v55 = vld [vmem:[%s1545_s7] sm:$0x1] }
 0x12f   :  { %1218 = vmatprep.subr.bf16.mxu1 %v1438_v60  ;;  %v352_v56 = vadd.f32 %v351_v55, %v350_v54 }
 0x131   :  { %v1035_v28 = vpop.f32.mrb[12].mxu0  ;;  %1085 = vmatmul.mubr.f32.gmra.mrb[10].mxu1 %v1032_v26  ;;  %v1496_v58 = vrot.slane %v352_v56, %v678_v57 }
 0x132   :  { %1226 = vmatpush3.bf16.msra.mxu1 %v1438_v60  ;;  %v252_v29 = vpop.f32.mrb[13].mxu0 }
 0x133   :  { %v1036_v30 = vpop.f32.mrb[14].mxu0  ;;  %1087 = vmatprep.mubr.f32.mxu1 %v252_v29  ;;  %1219 = vmatprep.subr.bf16.mxu1 %v1442_v63 }
 0x134   :  { %v255_v32 = vpop.f32.mrb[15].mxu0 }
 0x135   :  { %1088 = vmatmul.mubr.f32.gmra.mrb[12].mxu1 %v255_v32 }
 0x136   :  { %1227 = vmatpush3.bf16.msra.mxu1 %v1442_v63  ;;  %1090 = vmatprep.mubr.f32.mxu1 %v1035_v28 }
 0x137   :  { %1220 = vmatprep.subr.bf16.mxu1 %v1447_v3 }
 0x139   :  { %1091 = vmatmul.mubr.f32.gmra.mrb[14].mxu1 %v1036_v30  ;;  %v1127_v44 = vpop.f32.mrb[16].mxu0 }
 0x13a   :  { %1228 = vmatpush3.bf16.msra.mxu1 %v1447_v3  ;;  %1137 = vmatprep.mubr.f32.mxu1 %v857_v33  ;;  %v596_v45 = vpop.f32.mrb[17].mxu0 }
 0x13d   :  { %1138 = vmatmul.mubr.f32.vlgmr.msra.gmra.mrb[8].mxu1 %v858_v35  ;;  %v1130_v46 = vpop.f32.mrb[18].mxu0 }
 0x13e   :  { %1140 = vmatprep.mubr.f32.mxu1 %v861_v36  ;;  %v606_v47 = vpop.f32.mrb[19].mxu0 }
 0x141   :  { %1141 = vmatmul.mubr.f32.gmra.mrb[10].mxu1 %v862_v38  ;;  %v1133_v48 = vpop.f32.mrb[20].mxu0 }
 0x142   :  { %1143 = vmatprep.mubr.f32.mxu1 %v865_v39  ;;  %v616_v49 = vpop.f32.mrb[21].mxu0 }
 0x145   :  { %1144 = vmatmul.mubr.f32.gmra.mrb[12].mxu1 %v866_v41  ;;  %v1136_v50 = vpop.f32.mrb[22].mxu0 }
 0x146   :  { %1146 = vmatprep.mubr.f32.mxu1 %v869_v42  ;;  %v626_v51 = vpop.f32.mrb[23].mxu0 }
 0x149   :  { %1147 = vmatmul.mubr.f32.gmra.mrb[14].mxu1 %v870_v43 }
 0x1f0   :  { %v1071_v59 = vpop.f32.mrb[0].mxu1 }
 0x1f1   :  { %v602_v60 = vadd.f32 %v1127_v44, %v1071_v59  ;;  %v451_v61 = vpop.f32.mrb[1].mxu1 }
 0x1f2   :  { %v597_v62 = vadd.f32 %v596_v45, %v451_v61 }
 0x1f3   :  { %v682_v63 = vadd.f32 %v1496_v58, %v602_v60 }
 0x1f4   :  { %v681_v0 = vadd.f32 %v1496_v58, %v597_v62  ;;  %v1074_v1 = vpop.f32.mrb[2].mxu1 }
 0x1f5   :  { %v698_v2 = vmax.f32 %v682_v63, 0.0  ;;  %v612_v3 = vadd.f32 %v1130_v46, %v1074_v1  ;;  %v461_v4 = vpop.f32.mrb[3].mxu1 }
 0x1f6   :  { %v697_v5 = vmax.f32 %v681_v0, 0.0  ;;  %v607_v6 = vadd.f32 %v606_v47, %v461_v4 }
 0x1f7   :  { %v684_v7 = vadd.f32 %v1496_v58, %v612_v3 }
 0x1f8   :  { %v874_v8 = vpack.c.bf16 %v698_v2, %v697_v5  ;;  %v683_v9 = vadd.f32 %v1496_v58, %v607_v6  ;;  %v1077_v10 = vpop.f32.mrb[4].mxu1 }
 0x1f9   :  { %v700_v11 = vmax.f32 %v684_v7, 0.0  ;;  %v622_v12 = vadd.f32 %v1133_v48, %v1077_v10  ;;  %v471_v13 = vpop.f32.mrb[5].mxu1 }
 0x1fa   :  { %875 = vst [vmem:[%s1546_s8] sm:$0xff] %v874_v8   ;;  %v699_v14 = vmax.f32 %v683_v9, 0.0  ;;  %v617_v15 = vadd.f32 %v616_v49, %v471_v13 }
 0x1fb   :  { %v686_v16 = vadd.f32 %v1496_v58, %v622_v12 }
 0x1fc   :  { %v879_v17 = vpack.c.bf16 %v700_v11, %v699_v14  ;;  %v685_v18 = vadd.f32 %v1496_v58, %v617_v15  ;;  %v1080_v19 = vpop.f32.mrb[6].mxu1 }
 0x1fd   :  { %v702_v20 = vmax.f32 %v686_v16, 0.0  ;;  %v632_v21 = vadd.f32 %v1136_v50, %v1080_v19  ;;  %v481_v22 = vpop.f32.mrb[7].mxu1 }
 0x1fe   :  { %918 = vst [vmem:[%s1546_s8 + $0x8] sm:$0xff] %v879_v17   ;;  %v701_v23 = vmax.f32 %v685_v18, 0.0  ;;  %v627_v24 = vadd.f32 %v626_v51, %v481_v22 }
 0x1ff   :  { %v688_v25 = vadd.f32 %v1496_v58, %v632_v21 }
 0x200   :  { %v884_v26 = vpack.c.bf16 %v702_v20, %v701_v23  ;;  %v687_v27 = vadd.f32 %v1496_v58, %v627_v24 }
 0x201   :  { %v704_v28 = vmax.f32 %v688_v25, 0.0 }
 0x202   :  { %919 = vst [vmem:[%s1546_s8 + $0x10] sm:$0xff] %v884_v26   ;;  %v703_v29 = vmax.f32 %v687_v27, 0.0 }
 0x204   :  { %v889_v30 = vpack.c.bf16 %v704_v28, %v703_v29 }
 0x206   :  { %920 = vst [vmem:[%s1546_s8 + $0x18] sm:$0xff] %v889_v30  }
 0x210   :  { %v1139_v31 = vpop.f32.mrb[8].mxu1 }
 0x211   :  { %v690_v32 = vadd.f32 %v1139_v31, %v1496_v58  ;;  %v636_v33 = vpop.f32.mrb[9].mxu1 }
 0x212   :  { %v689_v34 = vadd.f32 %v1496_v58, %v636_v33 }
 0x213   :  { %v706_v35 = vmax.f32 %v690_v32, 0.0 }
 0x214   :  { %v705_v36 = vmax.f32 %v689_v34, 0.0  ;;  %v1142_v37 = vpop.f32.mrb[10].mxu1 }
 0x215   :  { %v692_v38 = vadd.f32 %v1142_v37, %v1496_v58  ;;  %v646_v39 = vpop.f32.mrb[11].mxu1 }
 0x216   :  { %v894_v40 = vpack.c.bf16 %v706_v35, %v705_v36  ;;  %v691_v41 = vadd.f32 %v1496_v58, %v646_v39 }
 0x217   :  { %v708_v42 = vmax.f32 %v692_v38, 0.0 }
 0x218   :  { %921 = vst [vmem:[%s1546_s8 + $0x20] sm:$0xff] %v894_v40   ;;  %v707_v43 = vmax.f32 %v691_v41, 0.0  ;;  %v1145_v44 = vpop.f32.mrb[12].mxu1 }
 0x219   :  { %v694_v45 = vadd.f32 %v1145_v44, %v1496_v58  ;;  %v656_v46 = vpop.f32.mrb[13].mxu1 }
 0x21a   :  { %v899_v47 = vpack.c.bf16 %v708_v42, %v707_v43  ;;  %v693_v48 = vadd.f32 %v1496_v58, %v656_v46 }
 0x21b   :  { %v710_v49 = vmax.f32 %v694_v45, 0.0 }
 0x21c   :  { %922 = vst [vmem:[%s1546_s8 + $0x28] sm:$0xff] %v899_v47   ;;  %v709_v50 = vmax.f32 %v693_v48, 0.0  ;;  %v1148_v51 = vpop.f32.mrb[14].mxu1 }
 0x21d   :  { %v696_v52 = vadd.f32 %v1148_v51, %v1496_v58  ;;  %v666_v53 = vpop.f32.mrb[15].mxu1 }
 0x21e   :  { %v904_v54 = vpack.c.bf16 %v710_v49, %v709_v50  ;;  %v695_v55 = vadd.f32 %v1496_v58, %v666_v53 }
 0x21f   :  { %v712_v56 = vmax.f32 %v696_v52, 0.0 }
 0x220   :  { %923 = vst [vmem:[%s1546_s8 + $0x30] sm:$0xff] %v904_v54   ;;  %v711_v57 = vmax.f32 %v695_v55, 0.0 }
 0x222   :  { %v909_v59 = vpack.c.bf16 %v712_v56, %v711_v57 }
 0x224   :  { %924 = vst [vmem:[%s1546_s8 + $0x38] sm:$0xff] %v909_v59  }
 0x225   :  { %797 = vsyncpa [#allocation4], 1 }
 0x226   :  { %798 = vsyncpa [#allocation6], 1 }

</bundles_post_ra>
